<compile_context>
chip_gen: v6e
topology: v6e:2x2x1
jax: 0.10.0
libtpu: 0.0.40
codegen_flags: <defaults>
</compile_context>

<pallas_src>
import functools

import jax
import jax.numpy as jnp
from jax.experimental import pallas as pl
from jax.experimental.pallas import tpu as pltpu


# ----------------------------------------------------------------------------
# Host-side helper: validity masks for the 8 non-center conv taps
# ----------------------------------------------------------------------------

def _tap_masks(H, W):
    """(8, H*W) float32 masks (1 = valid source pixel) for 'same' padding,
    tap order (ky, kx) row-major with the centre tap skipped."""
    pos = jnp.arange(H * W, dtype=jnp.int32)
    yi = pos // W
    xi = pos - yi * W
    rows = []
    for ky in range(3):
        for kx in range(3):
            dy, dx = ky - 1, kx - 1
            if dy == 0 and dx == 0:
                continue
            valid = ((yi + dy >= 0) & (yi + dy < H) &
                     (xi + dx >= 0) & (xi + dx < W))
            rows.append(valid.astype(jnp.float32))
    return jnp.stack(rows)


# ----------------------------------------------------------------------------
# In-kernel 3x3 'same' convolution (roll-based im2col into a reused VMEM slab)
# ----------------------------------------------------------------------------

def _conv3x3(a, w_mat, b_col, mask_ref, patch_ref, H, W):
    """a: (C_in, H*W) f32.  w_mat: (C_out, 9*C_in).  b_col: (C_out, 1) f32.
    patch_ref: (9*C_in, H*W) VMEM scratch (matmul dtype), reused across calls.
    Returns (C_out, H*W) float32."""
    hw = H * W
    C = a.shape[0]
    m = 0
    for k in range(9):
        ky, kx = divmod(k, 3)
        dy, dx = ky - 1, kx - 1
        # Source pixel for output p is p + dy*W + dx; rotate by -(dy*W+dx)
        # brings it to position p.  Row/image wraps land exactly on the
        # masked border taps, so zeroing them reproduces 'same' padding.
        shift = (-(dy * W + dx)) % hw
        t = a if shift == 0 else pltpu.roll(a, shift, axis=1)
        if dy != 0 or dx != 0:
            t = t * mask_ref[pl.ds(m, 1), :]          # (1, HW) halo mask
            m += 1
        patch_ref[pl.ds(k * C, C), :] = t.astype(patch_ref.dtype)
    acc = jnp.dot(w_mat, patch_ref[...], preferred_element_type=jnp.float32)
    return acc + b_col


# ----------------------------------------------------------------------------
# Fused ResidualGroup kernel
# ----------------------------------------------------------------------------

def residual_group_kernel(x_ref, mask_ref,
                          w1_ref, b1_ref, w2_ref, b2_ref,
                          wd_ref, bd_ref, wu_ref, bu_ref,
                          wl_ref, bl_ref,
                          o_ref, act_ref, patch_ref, *, H, W):
    """grid = (batch, n_resblocks).

    Every step runs one RCAB (conv-ReLU-conv + CALayer + residual).  The last
    step additionally applies the trailing group conv3x3 + group residual and
    writes the output.  The running activation is carried in `act_ref`."""
    step = pl.program_id(1)
    last = pl.num_programs(1) - 1

    x = x_ref[0]                                                  # (C, HW)
    # First RCAB reads the group input directly (no VMEM->VMEM init copy).
    a = jnp.where(step == 0, x, act_ref[...])

    # --- RCAB body: conv3x3 -> ReLU -> conv3x3 ---
    h = jnp.maximum(
        _conv3x3(a, w1_ref[0], b1_ref[0], mask_ref, patch_ref, H, W), 0.0)
    res = _conv3x3(h, w2_ref[0], b2_ref[0], mask_ref, patch_ref, H, W)

    # --- CALayer: global avg pool -> 1x1 conv -> ReLU -> 1x1 conv -> sigmoid
    pooled = jnp.mean(res, axis=1, keepdims=True)                 # (C, 1)
    z = jnp.maximum(
        jnp.dot(wd_ref[0], pooled,
                preferred_element_type=jnp.float32) + bd_ref[0], 0.0)
    gate = jax.nn.sigmoid(
        jnp.dot(wu_ref[0], z,
                preferred_element_type=jnp.float32) + bu_ref[0])  # (C, 1)

    act = res * gate + a                                          # RCAB residual
    act_ref[...] = act

    # --- last step: trailing group conv + group residual, write output ---
    @pl.when(step == last)
    def _tail():
        res_t = _conv3x3(act, wl_ref[...], bl_ref[...], mask_ref, patch_ref, H, W)
        o_ref[0] = res_t + x


# ----------------------------------------------------------------------------
# Wrapper
# ----------------------------------------------------------------------------

def residual_group_forward(x_nchw, params, *, matmul_dtype=jnp.bfloat16):
    """ResidualGroup.forward.  x_nchw: (N, C, H, W) float32."""
    N, C, H, W = x_nchw.shape
    HW = H * W
    n_resblocks = len(params["blocks"])
    c_red = params["blocks"][0]["wd"].shape[1]

    def flat_conv_w(w_hwio):
        # (3, 3, Cin, Cout) HWIO -> (Cout, 9*Cin), tap order (ky, kx) then Cin.
        return (jnp.transpose(w_hwio, (3, 0, 1, 2))
                .reshape(C, 9 * C).astype(matmul_dtype))

    w1s = jnp.stack([flat_conv_w(b["w1"]) for b in params["blocks"]])
    b1s = jnp.stack([b["b1"].reshape(C, 1) for b in params["blocks"]])
    w2s = jnp.stack([flat_conv_w(b["w2"]) for b in params["blocks"]])
    b2s = jnp.stack([b["b2"].reshape(C, 1) for b in params["blocks"]])
    wds = jnp.stack([b["wd"].T for b in params["blocks"]])         # (c_red, C)
    bds = jnp.stack([b["bd"].reshape(c_red, 1) for b in params["blocks"]])
    wus = jnp.stack([b["wu"].T for b in params["blocks"]])         # (C, c_red)
    bus = jnp.stack([b["bu"].reshape(C, 1) for b in params["blocks"]])
    w_last = flat_conv_w(params["w_last"])
    b_last = params["b_last"].reshape(C, 1)

    masks = _tap_masks(H, W)                                       # (8, HW) f32

    # NCHW is already channels-then-spatial: flatten H, W onto the lanes.
    x_flat = x_nchw.reshape(N, C, HW)

    def stream(shape):          # per-block weights, streamed along the step axis
        return pl.BlockSpec((1,) + shape, lambda n, i: (i, 0, 0))

    def resident(shape):        # step-invariant inputs, stay resident in VMEM
        return pl.BlockSpec(shape, lambda n, i, _s=len(shape): (0,) * _s)

    out = pl.pallas_call(
        functools.partial(residual_group_kernel, H=H, W=W),
        out_shape=jax.ShapeDtypeStruct((N, C, HW), jnp.float32),
        grid=(N, n_resblocks),
        in_specs=[
            pl.BlockSpec((1, C, HW), lambda n, i: (n, 0, 0)),     # group input
            resident((8, HW)),                                    # border masks
            stream((C, 9 * C)), stream((C, 1)),                   # RCAB conv1
            stream((C, 9 * C)), stream((C, 1)),                   # RCAB conv2
            stream((c_red, C)), stream((c_red, 1)),               # CA down (1x1)
            stream((C, c_red)), stream((C, 1)),                   # CA up   (1x1)
            resident((C, 9 * C)), resident((C, 1)),               # trailing conv
        ],
        out_specs=pl.BlockSpec((1, C, HW), lambda n, i: (n, 0, 0)),
        scratch_shapes=[
            pltpu.VMEM((C, HW), jnp.float32),        # carried activation
            pltpu.VMEM((9 * C, HW), matmul_dtype),   # reused im2col slab
        ],
        compiler_params=pltpu.CompilerParams(
            dimension_semantics=("parallel", "arbitrary")),
    )(x_flat, masks, w1s, b1s, w2s, b2s, wds, bds, wus, bus, w_last, b_last)
    return out.reshape(N, C, H, W)


# ----------------------------------------------------------------------------
# Parameters + pure-JAX reference (for an in-script correctness check)
# ----------------------------------------------------------------------------

def init_params(key, n_feat, reduction, n_resblocks):
    """Deterministic synthetic parameters (shapes match the nn.Module)."""
    c_red = n_feat // reduction
    params = {"blocks": []}
    for _ in range(n_resblocks):
        key, *ks = jax.random.split(key, 9)
        blk = dict(
            w1=0.05 * jax.random.normal(ks[0], (3, 3, n_feat, n_feat), jnp.float32),
            b1=0.05 * jax.random.normal(ks[1], (n_feat,), jnp.float32),
            w2=0.05 * jax.random.normal(ks[2], (3, 3, n_feat, n_feat), jnp.float32),
            b2=0.05 * jax.random.normal(ks[3], (n_feat,), jnp.float32),
            # 1x1 convs of CALayer stored as (Cin, Cout) matmul weights.
            wd=0.05 * jax.random.normal(ks[4], (n_feat, c_red), jnp.float32),
            bd=0.05 * jax.random.normal(ks[5], (c_red,), jnp.float32),
            wu=0.05 * jax.random.normal(ks[6], (c_red, n_feat), jnp.float32),
            bu=0.05 * jax.random.normal(ks[7], (n_feat,), jnp.float32),
        )
        params["blocks"].append(blk)
    key, k1, k2 = jax.random.split(key, 3)
    params["w_last"] = 0.05 * jax.random.normal(k1, (3, 3, n_feat, n_feat), jnp.float32)
    params["b_last"] = 0.05 * jax.random.normal(k2, (n_feat,), jnp.float32)
    return params


def _conv3x3_ref(x, w_hwio, b):
    y = jax.lax.conv_general_dilated(
        x, w_hwio, window_strides=(1, 1), padding="SAME",
        dimension_numbers=("NCHW", "HWIO", "NCHW"),
        precision=jax.lax.Precision.HIGHEST)
    return y + b.reshape(1, -1, 1, 1)


def residual_group_reference(x, params):
    y = x
    for blk in params["blocks"]:
        h = jax.nn.relu(_conv3x3_ref(y, blk["w1"], blk["b1"]))
        res = _conv3x3_ref(h, blk["w2"], blk["b2"])
        pooled = jnp.mean(res, axis=(2, 3))                              # (N, C)
        z = jax.nn.relu(jnp.dot(pooled, blk["wd"],
                                precision=jax.lax.Precision.HIGHEST) + blk["bd"])
        g = jax.nn.sigmoid(jnp.dot(z, blk["wu"],
                                   precision=jax.lax.Precision.HIGHEST) + blk["bu"])
        y = res * g[:, :, None, None] + y
    return _conv3x3_ref(y, params["w_last"], params["b_last"]) + x


# ----------------------------------------------------------------------------
# Main
# ----------------------------------------------------------------------------

if __name__ == "__main__":
    N, C, H, W = 2, 16, 16, 16
    reduction = 4
    n_resblocks = 2

    key = jax.random.PRNGKey(0)
    key, kx = jax.random.split(key)
    x = jax.random.normal(kx, (N, C, H, W), jnp.float32)

    params = init_params(key, n_feat=C, reduction=reduction,
                         n_resblocks=n_resblocks)

    ref = residual_group_reference(x, params)

    # 1) f32 matmul operands: layout/correctness check at the proven tolerance.
    out_f32 = jax.block_until_ready(
        residual_group_forward(x, params, matmul_dtype=jnp.float32))
    assert out_f32.shape == (N, C, H, W)
    err_f32 = float(jnp.max(jnp.abs(out_f32 - ref)))
    assert err_f32 < 1e-2, f"f32 max abs err vs reference: {err_f32}"

    # 2) bf16 matmul operands (recommended production config): looser bound.
    out_bf16 = jax.block_until_ready(
        residual_group_forward(x, params, matmul_dtype=jnp.bfloat16))
    err_bf16 = float(jnp.max(jnp.abs(out_bf16 - ref)))
    assert err_bf16 < 5e-2, f"bf16 max abs err vs reference: {err_bf16}"

    print("KERNEL_OK")
</pallas_src>

<mosaic_0001>
module attributes {stable_mosaic.version = 11 : i64} {
  func.func @residual_group_kernel(%arg0: i32, %arg1: i32, %arg2: memref<1x16x256xf32, #tpu.memory_space<vmem>>, %arg3: memref<8x256xf32, #tpu.memory_space<vmem>>, %arg4: memref<1x16x144xf32, #tpu.memory_space<vmem>>, %arg5: memref<1x16x1xf32, #tpu.memory_space<vmem>>, %arg6: memref<1x16x144xf32, #tpu.memory_space<vmem>>, %arg7: memref<1x16x1xf32, #tpu.memory_space<vmem>>, %arg8: memref<1x4x16xf32, #tpu.memory_space<vmem>>, %arg9: memref<1x4x1xf32, #tpu.memory_space<vmem>>, %arg10: memref<1x16x4xf32, #tpu.memory_space<vmem>>, %arg11: memref<1x16x1xf32, #tpu.memory_space<vmem>>, %arg12: memref<16x144xf32, #tpu.memory_space<vmem>>, %arg13: memref<16x1xf32, #tpu.memory_space<vmem>>, %arg14: memref<1x16x256xf32, #tpu.memory_space<vmem>>, %arg15: memref<16x256xf32, #tpu.memory_space<vmem>>, %arg16: memref<144x256xf32, #tpu.memory_space<vmem>>) attributes {dimension_semantics = [#tpu.dimension_semantics<parallel>, #tpu.dimension_semantics<arbitrary>], iteration_bounds = array<i64: 2, 2>, scalar_prefetch = 0 : i64, scratch_operands = 2 : i64, tpu.core_type = #tpu.core_type<tc>, window_params = [{transform_indices = @transform_0, window_bounds = array<i64: 1, 16, 256>}, {pipeline_mode = #tpu.pipeline_mode<synchronous>, transform_indices = @transform_1, window_bounds = array<i64: 8, 256>}, {transform_indices = @transform_2, window_bounds = array<i64: 1, 16, 144>}, {transform_indices = @transform_3, window_bounds = array<i64: 1, 16, 1>}, {transform_indices = @transform_4, window_bounds = array<i64: 1, 16, 144>}, {transform_indices = @transform_5, window_bounds = array<i64: 1, 16, 1>}, {transform_indices = @transform_6, window_bounds = array<i64: 1, 4, 16>}, {transform_indices = @transform_7, window_bounds = array<i64: 1, 4, 1>}, {transform_indices = @transform_8, window_bounds = array<i64: 1, 16, 4>}, {transform_indices = @transform_9, window_bounds = array<i64: 1, 16, 1>}, {pipeline_mode = #tpu.pipeline_mode<synchronous>, transform_indices = @transform_10, window_bounds = array<i64: 16, 144>}, {pipeline_mode = #tpu.pipeline_mode<synchronous>, transform_indices = @transform_11, window_bounds = array<i64: 16, 1>}, {transform_indices = @transform_12, window_bounds = array<i64: 1, 16, 256>}]} {
    %c0 = arith.constant 0 : index
    %c0_0 = arith.constant 0 : index
    %c0_1 = arith.constant 0 : index
    %0 = vector.load %arg2[%c0, %c0_0, %c0_1] : memref<1x16x256xf32, #tpu.memory_space<vmem>>, vector<1x16x256xf32>
    %1 = vector.shape_cast %0 : vector<1x16x256xf32> to vector<16x256xf32>
    %c0_i32 = arith.constant 0 : i32
    %2 = arith.cmpi eq, %arg1, %c0_i32 : i32
    %c0_2 = arith.constant 0 : index
    %c0_3 = arith.constant 0 : index
    %3 = vector.load %arg15[%c0_2, %c0_3] : memref<16x256xf32, #tpu.memory_space<vmem>>, vector<16x256xf32>
    %4 = arith.select %2, %1, %3 : vector<16x256xf32>
    %c0_4 = arith.constant 0 : index
    %c0_5 = arith.constant 0 : index
    %c0_6 = arith.constant 0 : index
    %5 = vector.load %arg4[%c0_4, %c0_5, %c0_6] : memref<1x16x144xf32, #tpu.memory_space<vmem>>, vector<1x16x144xf32>
    %6 = vector.shape_cast %5 : vector<1x16x144xf32> to vector<16x144xf32>
    %c0_7 = arith.constant 0 : index
    %c0_8 = arith.constant 0 : index
    %c0_9 = arith.constant 0 : index
    %7 = vector.load %arg5[%c0_7, %c0_8, %c0_9] : memref<1x16x1xf32, #tpu.memory_space<vmem>>, vector<1x16x1xf32>
    %8 = vector.shape_cast %7 : vector<1x16x1xf32> to vector<16x1xf32>
    %c17_i32 = arith.constant 17 : i32
    %9 = tpu.dynamic_rotate %4 by %c17_i32 dim 1 : vector<16x256xf32>, i32 -> vector<16x256xf32>
    %c0_10 = arith.constant 0 : index
    %c0_11 = arith.constant 0 : index
    %10 = vector.load %arg3[%c0_10, %c0_11] : memref<8x256xf32, #tpu.memory_space<vmem>>, vector<1x256xf32>
    %11 = vector.broadcast %10 : vector<1x256xf32> to vector<16x256xf32>
    %12 = arith.mulf %9, %11 : vector<16x256xf32>
    %c0_12 = arith.constant 0 : index
    %c0_13 = arith.constant 0 : index
    %13 = vector.load %arg16[%c0_12, %c0_13] : memref<144x256xf32, #tpu.memory_space<vmem>>, vector<16x256xf32>
    tpu.vector_store %arg16[%c0_12, %c0_13], %12 {strides = array<i32>} : memref<144x256xf32, #tpu.memory_space<vmem>>, vector<16x256xf32>,
    %c16_i32 = arith.constant 16 : i32
    %14 = tpu.dynamic_rotate %4 by %c16_i32 dim 1 : vector<16x256xf32>, i32 -> vector<16x256xf32>
    %c1 = arith.constant 1 : index
    %c0_14 = arith.constant 0 : index
    %15 = vector.load %arg3[%c1, %c0_14] : memref<8x256xf32, #tpu.memory_space<vmem>>, vector<1x256xf32>
    %16 = vector.broadcast %15 : vector<1x256xf32> to vector<16x256xf32>
    %17 = arith.mulf %14, %16 : vector<16x256xf32>
    %c16 = arith.constant 16 : index
    %c0_15 = arith.constant 0 : index
    %18 = vector.load %arg16[%c16, %c0_15] : memref<144x256xf32, #tpu.memory_space<vmem>>, vector<16x256xf32>
    tpu.vector_store %arg16[%c16, %c0_15], %17 {strides = array<i32>} : memref<144x256xf32, #tpu.memory_space<vmem>>, vector<16x256xf32>,
    %c15_i32 = arith.constant 15 : i32
    %19 = tpu.dynamic_rotate %4 by %c15_i32 dim 1 : vector<16x256xf32>, i32 -> vector<16x256xf32>
    %c2 = arith.constant 2 : index
    %c0_16 = arith.constant 0 : index
    %20 = vector.load %arg3[%c2, %c0_16] : memref<8x256xf32, #tpu.memory_space<vmem>>, vector<1x256xf32>
    %21 = vector.broadcast %20 : vector<1x256xf32> to vector<16x256xf32>
    %22 = arith.mulf %19, %21 : vector<16x256xf32>
    %c32 = arith.constant 32 : index
    %c0_17 = arith.constant 0 : index
    %23 = vector.load %arg16[%c32, %c0_17] : memref<144x256xf32, #tpu.memory_space<vmem>>, vector<16x256xf32>
    tpu.vector_store %arg16[%c32, %c0_17], %22 {strides = array<i32>} : memref<144x256xf32, #tpu.memory_space<vmem>>, vector<16x256xf32>,
    %c1_i32 = arith.constant 1 : i32
    %24 = tpu.dynamic_rotate %4 by %c1_i32 dim 1 : vector<16x256xf32>, i32 -> vector<16x256xf32>
    %c3 = arith.constant 3 : index
    %c0_18 = arith.constant 0 : index
    %25 = vector.load %arg3[%c3, %c0_18] : memref<8x256xf32, #tpu.memory_space<vmem>>, vector<1x256xf32>
    %26 = vector.broadcast %25 : vector<1x256xf32> to vector<16x256xf32>
    %27 = arith.mulf %24, %26 : vector<16x256xf32>
    %c48 = arith.constant 48 : index
    %c0_19 = arith.constant 0 : index
    %28 = vector.load %arg16[%c48, %c0_19] : memref<144x256xf32, #tpu.memory_space<vmem>>, vector<16x256xf32>
    tpu.vector_store %arg16[%c48, %c0_19], %27 {strides = array<i32>} : memref<144x256xf32, #tpu.memory_space<vmem>>, vector<16x256xf32>,
    %c64 = arith.constant 64 : index
    %c0_20 = arith.constant 0 : index
    %29 = vector.load %arg16[%c64, %c0_20] : memref<144x256xf32, #tpu.memory_space<vmem>>, vector<16x256xf32>
    tpu.vector_store %arg16[%c64, %c0_20], %4 {strides = array<i32>} : memref<144x256xf32, #tpu.memory_space<vmem>>, vector<16x256xf32>,
    %c255_i32 = arith.constant 255 : i32
    %30 = tpu.dynamic_rotate %4 by %c255_i32 dim 1 : vector<16x256xf32>, i32 -> vector<16x256xf32>
    %c4 = arith.constant 4 : index
    %c0_21 = arith.constant 0 : index
    %31 = vector.load %arg3[%c4, %c0_21] : memref<8x256xf32, #tpu.memory_space<vmem>>, vector<1x256xf32>
    %32 = vector.broadcast %31 : vector<1x256xf32> to vector<16x256xf32>
    %33 = arith.mulf %30, %32 : vector<16x256xf32>
    %c80 = arith.constant 80 : index
    %c0_22 = arith.constant 0 : index
    %34 = vector.load %arg16[%c80, %c0_22] : memref<144x256xf32, #tpu.memory_space<vmem>>, vector<16x256xf32>
    tpu.vector_store %arg16[%c80, %c0_22], %33 {strides = array<i32>} : memref<144x256xf32, #tpu.memory_space<vmem>>, vector<16x256xf32>,
    %c241_i32 = arith.constant 241 : i32
    %35 = tpu.dynamic_rotate %4 by %c241_i32 dim 1 : vector<16x256xf32>, i32 -> vector<16x256xf32>
    %c5 = arith.constant 5 : index
    %c0_23 = arith.constant 0 : index
    %36 = vector.load %arg3[%c5, %c0_23] : memref<8x256xf32, #tpu.memory_space<vmem>>, vector<1x256xf32>
    %37 = vector.broadcast %36 : vector<1x256xf32> to vector<16x256xf32>
    %38 = arith.mulf %35, %37 : vector<16x256xf32>
    %c96 = arith.constant 96 : index
    %c0_24 = arith.constant 0 : index
    %39 = vector.load %arg16[%c96, %c0_24] : memref<144x256xf32, #tpu.memory_space<vmem>>, vector<16x256xf32>
    tpu.vector_store %arg16[%c96, %c0_24], %38 {strides = array<i32>} : memref<144x256xf32, #tpu.memory_space<vmem>>, vector<16x256xf32>,
    %c240_i32 = arith.constant 240 : i32
    %40 = tpu.dynamic_rotate %4 by %c240_i32 dim 1 : vector<16x256xf32>, i32 -> vector<16x256xf32>
    %c6 = arith.constant 6 : index
    %c0_25 = arith.constant 0 : index
    %41 = vector.load %arg3[%c6, %c0_25] : memref<8x256xf32, #tpu.memory_space<vmem>>, vector<1x256xf32>
    %42 = vector.broadcast %41 : vector<1x256xf32> to vector<16x256xf32>
    %43 = arith.mulf %40, %42 : vector<16x256xf32>
    %c112 = arith.constant 112 : index
    %c0_26 = arith.constant 0 : index
    %44 = vector.load %arg16[%c112, %c0_26] : memref<144x256xf32, #tpu.memory_space<vmem>>, vector<16x256xf32>
    tpu.vector_store %arg16[%c112, %c0_26], %43 {strides = array<i32>} : memref<144x256xf32, #tpu.memory_space<vmem>>, vector<16x256xf32>,
    %c239_i32 = arith.constant 239 : i32
    %45 = tpu.dynamic_rotate %4 by %c239_i32 dim 1 : vector<16x256xf32>, i32 -> vector<16x256xf32>
    %c7 = arith.constant 7 : index
    %c0_27 = arith.constant 0 : index
    %46 = vector.load %arg3[%c7, %c0_27] : memref<8x256xf32, #tpu.memory_space<vmem>>, vector<1x256xf32>
    %47 = vector.broadcast %46 : vector<1x256xf32> to vector<16x256xf32>
    %48 = arith.mulf %45, %47 : vector<16x256xf32>
    %c128 = arith.constant 128 : index
    %c0_28 = arith.constant 0 : index
    %49 = vector.load %arg16[%c128, %c0_28] : memref<144x256xf32, #tpu.memory_space<vmem>>, vector<16x256xf32>
    tpu.vector_store %arg16[%c128, %c0_28], %48 {strides = array<i32>} : memref<144x256xf32, #tpu.memory_space<vmem>>, vector<16x256xf32>,
    %c0_29 = arith.constant 0 : index
    %c0_30 = arith.constant 0 : index
    %50 = vector.load %arg16[%c0_29, %c0_30] : memref<144x256xf32, #tpu.memory_space<vmem>>, vector<144x256xf32>
    %cst = arith.constant dense<0.000000e+00> : vector<16x256xf32>
    %51 = tpu.matmul %6, %50, %cst {dimension_numbers = #tpu.dot_dimension_numbers<[1], [0], [0], [1], [0, 0, 1, 1], [], []>} : vector<16x144xf32>, vector<144x256xf32>, vector<16x256xf32> -> vector<16x256xf32>
    %52 = vector.broadcast %8 : vector<16x1xf32> to vector<16x256xf32>
    %53 = arith.addf %51, %52 : vector<16x256xf32>
    %cst_31 = arith.constant 0.000000e+00 : f32
    %54 = vector.broadcast %cst_31 : f32 to vector<16x256xf32>
    %55 = arith.maximumf %53, %54 : vector<16x256xf32>
    %c0_32 = arith.constant 0 : index
    %c0_33 = arith.constant 0 : index
    %c0_34 = arith.constant 0 : index
    %56 = vector.load %arg6[%c0_32, %c0_33, %c0_34] : memref<1x16x144xf32, #tpu.memory_space<vmem>>, vector<1x16x144xf32>
    %57 = vector.shape_cast %56 : vector<1x16x144xf32> to vector<16x144xf32>
    %c0_35 = arith.constant 0 : index
    %c0_36 = arith.constant 0 : index
    %c0_37 = arith.constant 0 : index
    %58 = vector.load %arg7[%c0_35, %c0_36, %c0_37] : memref<1x16x1xf32, #tpu.memory_space<vmem>>, vector<1x16x1xf32>
    %59 = vector.shape_cast %58 : vector<1x16x1xf32> to vector<16x1xf32>
    %c17_i32_38 = arith.constant 17 : i32
    %60 = tpu.dynamic_rotate %55 by %c17_i32_38 dim 1 : vector<16x256xf32>, i32 -> vector<16x256xf32>
    %c0_39 = arith.constant 0 : index
    %c0_40 = arith.constant 0 : index
    %61 = vector.load %arg3[%c0_39, %c0_40] : memref<8x256xf32, #tpu.memory_space<vmem>>, vector<1x256xf32>
    %62 = vector.broadcast %61 : vector<1x256xf32> to vector<16x256xf32>
    %63 = arith.mulf %60, %62 : vector<16x256xf32>
    %c0_41 = arith.constant 0 : index
    %c0_42 = arith.constant 0 : index
    %64 = vector.load %arg16[%c0_41, %c0_42] : memref<144x256xf32, #tpu.memory_space<vmem>>, vector<16x256xf32>
    tpu.vector_store %arg16[%c0_41, %c0_42], %63 {strides = array<i32>} : memref<144x256xf32, #tpu.memory_space<vmem>>, vector<16x256xf32>,
    %c16_i32_43 = arith.constant 16 : i32
    %65 = tpu.dynamic_rotate %55 by %c16_i32_43 dim 1 : vector<16x256xf32>, i32 -> vector<16x256xf32>
    %c1_44 = arith.constant 1 : index
    %c0_45 = arith.constant 0 : index
    %66 = vector.load %arg3[%c1_44, %c0_45] : memref<8x256xf32, #tpu.memory_space<vmem>>, vector<1x256xf32>
    %67 = vector.broadcast %66 : vector<1x256xf32> to vector<16x256xf32>
    %68 = arith.mulf %65, %67 : vector<16x256xf32>
    %c16_46 = arith.constant 16 : index
    %c0_47 = arith.constant 0 : index
    %69 = vector.load %arg16[%c16_46, %c0_47] : memref<144x256xf32, #tpu.memory_space<vmem>>, vector<16x256xf32>
    tpu.vector_store %arg16[%c16_46, %c0_47], %68 {strides = array<i32>} : memref<144x256xf32, #tpu.memory_space<vmem>>, vector<16x256xf32>,
    %c15_i32_48 = arith.constant 15 : i32
    %70 = tpu.dynamic_rotate %55 by %c15_i32_48 dim 1 : vector<16x256xf32>, i32 -> vector<16x256xf32>
    %c2_49 = arith.constant 2 : index
    %c0_50 = arith.constant 0 : index
    %71 = vector.load %arg3[%c2_49, %c0_50] : memref<8x256xf32, #tpu.memory_space<vmem>>, vector<1x256xf32>
    %72 = vector.broadcast %71 : vector<1x256xf32> to vector<16x256xf32>
    %73 = arith.mulf %70, %72 : vector<16x256xf32>
    %c32_51 = arith.constant 32 : index
    %c0_52 = arith.constant 0 : index
    %74 = vector.load %arg16[%c32_51, %c0_52] : memref<144x256xf32, #tpu.memory_space<vmem>>, vector<16x256xf32>
    tpu.vector_store %arg16[%c32_51, %c0_52], %73 {strides = array<i32>} : memref<144x256xf32, #tpu.memory_space<vmem>>, vector<16x256xf32>,
    %c1_i32_53 = arith.constant 1 : i32
    %75 = tpu.dynamic_rotate %55 by %c1_i32_53 dim 1 : vector<16x256xf32>, i32 -> vector<16x256xf32>
    %c3_54 = arith.constant 3 : index
    %c0_55 = arith.constant 0 : index
    %76 = vector.load %arg3[%c3_54, %c0_55] : memref<8x256xf32, #tpu.memory_space<vmem>>, vector<1x256xf32>
    %77 = vector.broadcast %76 : vector<1x256xf32> to vector<16x256xf32>
    %78 = arith.mulf %75, %77 : vector<16x256xf32>
    %c48_56 = arith.constant 48 : index
    %c0_57 = arith.constant 0 : index
    %79 = vector.load %arg16[%c48_56, %c0_57] : memref<144x256xf32, #tpu.memory_space<vmem>>, vector<16x256xf32>
    tpu.vector_store %arg16[%c48_56, %c0_57], %78 {strides = array<i32>} : memref<144x256xf32, #tpu.memory_space<vmem>>, vector<16x256xf32>,
    %c64_58 = arith.constant 64 : index
    %c0_59 = arith.constant 0 : index
    %80 = vector.load %arg16[%c64_58, %c0_59] : memref<144x256xf32, #tpu.memory_space<vmem>>, vector<16x256xf32>
    tpu.vector_store %arg16[%c64_58, %c0_59], %55 {strides = array<i32>} : memref<144x256xf32, #tpu.memory_space<vmem>>, vector<16x256xf32>,
    %c255_i32_60 = arith.constant 255 : i32
    %81 = tpu.dynamic_rotate %55 by %c255_i32_60 dim 1 : vector<16x256xf32>, i32 -> vector<16x256xf32>
    %c4_61 = arith.constant 4 : index
    %c0_62 = arith.constant 0 : index
    %82 = vector.load %arg3[%c4_61, %c0_62] : memref<8x256xf32, #tpu.memory_space<vmem>>, vector<1x256xf32>
    %83 = vector.broadcast %82 : vector<1x256xf32> to vector<16x256xf32>
    %84 = arith.mulf %81, %83 : vector<16x256xf32>
    %c80_63 = arith.constant 80 : index
    %c0_64 = arith.constant 0 : index
    %85 = vector.load %arg16[%c80_63, %c0_64] : memref<144x256xf32, #tpu.memory_space<vmem>>, vector<16x256xf32>
    tpu.vector_store %arg16[%c80_63, %c0_64], %84 {strides = array<i32>} : memref<144x256xf32, #tpu.memory_space<vmem>>, vector<16x256xf32>,
    %c241_i32_65 = arith.constant 241 : i32
    %86 = tpu.dynamic_rotate %55 by %c241_i32_65 dim 1 : vector<16x256xf32>, i32 -> vector<16x256xf32>
    %c5_66 = arith.constant 5 : index
    %c0_67 = arith.constant 0 : index
    %87 = vector.load %arg3[%c5_66, %c0_67] : memref<8x256xf32, #tpu.memory_space<vmem>>, vector<1x256xf32>
    %88 = vector.broadcast %87 : vector<1x256xf32> to vector<16x256xf32>
    %89 = arith.mulf %86, %88 : vector<16x256xf32>
    %c96_68 = arith.constant 96 : index
    %c0_69 = arith.constant 0 : index
    %90 = vector.load %arg16[%c96_68, %c0_69] : memref<144x256xf32, #tpu.memory_space<vmem>>, vector<16x256xf32>
    tpu.vector_store %arg16[%c96_68, %c0_69], %89 {strides = array<i32>} : memref<144x256xf32, #tpu.memory_space<vmem>>, vector<16x256xf32>,
    %c240_i32_70 = arith.constant 240 : i32
    %91 = tpu.dynamic_rotate %55 by %c240_i32_70 dim 1 : vector<16x256xf32>, i32 -> vector<16x256xf32>
    %c6_71 = arith.constant 6 : index
    %c0_72 = arith.constant 0 : index
    %92 = vector.load %arg3[%c6_71, %c0_72] : memref<8x256xf32, #tpu.memory_space<vmem>>, vector<1x256xf32>
    %93 = vector.broadcast %92 : vector<1x256xf32> to vector<16x256xf32>
    %94 = arith.mulf %91, %93 : vector<16x256xf32>
    %c112_73 = arith.constant 112 : index
    %c0_74 = arith.constant 0 : index
    %95 = vector.load %arg16[%c112_73, %c0_74] : memref<144x256xf32, #tpu.memory_space<vmem>>, vector<16x256xf32>
    tpu.vector_store %arg16[%c112_73, %c0_74], %94 {strides = array<i32>} : memref<144x256xf32, #tpu.memory_space<vmem>>, vector<16x256xf32>,
    %c239_i32_75 = arith.constant 239 : i32
    %96 = tpu.dynamic_rotate %55 by %c239_i32_75 dim 1 : vector<16x256xf32>, i32 -> vector<16x256xf32>
    %c7_76 = arith.constant 7 : index
    %c0_77 = arith.constant 0 : index
    %97 = vector.load %arg3[%c7_76, %c0_77] : memref<8x256xf32, #tpu.memory_space<vmem>>, vector<1x256xf32>
    %98 = vector.broadcast %97 : vector<1x256xf32> to vector<16x256xf32>
    %99 = arith.mulf %96, %98 : vector<16x256xf32>
    %c128_78 = arith.constant 128 : index
    %c0_79 = arith.constant 0 : index
    %100 = vector.load %arg16[%c128_78, %c0_79] : memref<144x256xf32, #tpu.memory_space<vmem>>, vector<16x256xf32>
    tpu.vector_store %arg16[%c128_78, %c0_79], %99 {strides = array<i32>} : memref<144x256xf32, #tpu.memory_space<vmem>>, vector<16x256xf32>,
    %c0_80 = arith.constant 0 : index
    %c0_81 = arith.constant 0 : index
    %101 = vector.load %arg16[%c0_80, %c0_81] : memref<144x256xf32, #tpu.memory_space<vmem>>, vector<144x256xf32>
    %cst_82 = arith.constant dense<0.000000e+00> : vector<16x256xf32>
    %102 = tpu.matmul %57, %101, %cst_82 {dimension_numbers = #tpu.dot_dimension_numbers<[1], [0], [0], [1], [0, 0, 1, 1], [], []>} : vector<16x144xf32>, vector<144x256xf32>, vector<16x256xf32> -> vector<16x256xf32>
    %103 = vector.broadcast %59 : vector<16x1xf32> to vector<16x256xf32>
    %104 = arith.addf %102, %103 : vector<16x256xf32>
    %cst_83 = arith.constant dense<0.000000e+00> : vector<16xf32>
    %105 = vector.multi_reduction <add>, %104, %cst_83 [1] : vector<16x256xf32> to vector<16xf32>
    %106 = vector.shape_cast %105 : vector<16xf32> to vector<16x1xf32>
    %cst_84 = arith.constant 2.560000e+02 : f32
    %107 = vector.broadcast %cst_84 : f32 to vector<16x1xf32>
    %108 = arith.divf %106, %107 : vector<16x1xf32>
    %c0_85 = arith.constant 0 : index
    %c0_86 = arith.constant 0 : index
    %c0_87 = arith.constant 0 : index
    %109 = vector.load %arg8[%c0_85, %c0_86, %c0_87] : memref<1x4x16xf32, #tpu.memory_space<vmem>>, vector<1x4x16xf32>
    %110 = vector.shape_cast %109 : vector<1x4x16xf32> to vector<4x16xf32>
    %cst_88 = arith.constant dense<0.000000e+00> : vector<4x1xf32>
    %111 = tpu.matmul %110, %108, %cst_88 {dimension_numbers = #tpu.dot_dimension_numbers<[1], [0], [0], [1], [0, 0, 1, 1], [], []>} : vector<4x16xf32>, vector<16x1xf32>, vector<4x1xf32> -> vector<4x1xf32>
    %c0_89 = arith.constant 0 : index
    %c0_90 = arith.constant 0 : index
    %c0_91 = arith.constant 0 : index
    %112 = vector.load %arg9[%c0_89, %c0_90, %c0_91] : memref<1x4x1xf32, #tpu.memory_space<vmem>>, vector<1x4x1xf32>
    %113 = vector.shape_cast %112 : vector<1x4x1xf32> to vector<4x1xf32>
    %114 = arith.addf %111, %113 : vector<4x1xf32>
    %cst_92 = arith.constant 0.000000e+00 : f32
    %115 = vector.broadcast %cst_92 : f32 to vector<4x1xf32>
    %116 = arith.maximumf %114, %115 : vector<4x1xf32>
    %c0_93 = arith.constant 0 : index
    %c0_94 = arith.constant 0 : index
    %c0_95 = arith.constant 0 : index
    %117 = vector.load %arg10[%c0_93, %c0_94, %c0_95] : memref<1x16x4xf32, #tpu.memory_space<vmem>>, vector<1x16x4xf32>
    %118 = vector.shape_cast %117 : vector<1x16x4xf32> to vector<16x4xf32>
    %cst_96 = arith.constant dense<0.000000e+00> : vector<16x1xf32>
    %119 = tpu.matmul %118, %116, %cst_96 {dimension_numbers = #tpu.dot_dimension_numbers<[1], [0], [0], [1], [0, 0, 1, 1], [], []>} : vector<16x4xf32>, vector<4x1xf32>, vector<16x1xf32> -> vector<16x1xf32>
    %c0_97 = arith.constant 0 : index
    %c0_98 = arith.constant 0 : index
    %c0_99 = arith.constant 0 : index
    %120 = vector.load %arg11[%c0_97, %c0_98, %c0_99] : memref<1x16x1xf32, #tpu.memory_space<vmem>>, vector<1x16x1xf32>
    %121 = vector.shape_cast %120 : vector<1x16x1xf32> to vector<16x1xf32>
    %122 = arith.addf %119, %121 : vector<16x1xf32>
    %123 = arith.negf %122 : vector<16x1xf32>
    %124 = math.exp %123 : vector<16x1xf32>
    %cst_100 = arith.constant 1.000000e+00 : f32
    %125 = vector.broadcast %cst_100 : f32 to vector<16x1xf32>
    %126 = arith.addf %125, %124 : vector<16x1xf32>
    %127 = arith.divf %125, %126 : vector<16x1xf32>
    %128 = vector.broadcast %127 : vector<16x1xf32> to vector<16x256xf32>
    %129 = arith.mulf %104, %128 : vector<16x256xf32>
    %130 = arith.addf %129, %4 : vector<16x256xf32>
    %c0_101 = arith.constant 0 : index
    %c0_102 = arith.constant 0 : index
    %131 = vector.load %arg15[%c0_101, %c0_102] : memref<16x256xf32, #tpu.memory_space<vmem>>, vector<16x256xf32>
    tpu.vector_store %arg15[%c0_101, %c0_102], %130 {strides = array<i32>} : memref<16x256xf32, #tpu.memory_space<vmem>>, vector<16x256xf32>,
    %c1_i32_103 = arith.constant 1 : i32
    %132 = arith.cmpi eq, %arg1, %c1_i32_103 : i32
    %133 = arith.extui %132 : i1 to i32
    %c0_i32_104 = arith.constant 0 : i32
    %134 = arith.cmpi ne, %133, %c0_i32_104 : i32
    scf.if %134 {
      %c0_105 = arith.constant 0 : index
      %c0_106 = arith.constant 0 : index
      %135 = vector.load %arg12[%c0_105, %c0_106] : memref<16x144xf32, #tpu.memory_space<vmem>>, vector<16x144xf32>
      %c0_107 = arith.constant 0 : index
      %c0_108 = arith.constant 0 : index
      %136 = vector.load %arg13[%c0_107, %c0_108] : memref<16x1xf32, #tpu.memory_space<vmem>>, vector<16x1xf32>
      %c17_i32_109 = arith.constant 17 : i32
      %137 = tpu.dynamic_rotate %130 by %c17_i32_109 dim 1 : vector<16x256xf32>, i32 -> vector<16x256xf32>
      %c0_110 = arith.constant 0 : index
      %c0_111 = arith.constant 0 : index
      %138 = vector.load %arg3[%c0_110, %c0_111] : memref<8x256xf32, #tpu.memory_space<vmem>>, vector<1x256xf32>
      %139 = vector.broadcast %138 : vector<1x256xf32> to vector<16x256xf32>
      %140 = arith.mulf %137, %139 : vector<16x256xf32>
      %c0_112 = arith.constant 0 : index
      %c0_113 = arith.constant 0 : index
      %141 = vector.load %arg16[%c0_112, %c0_113] : memref<144x256xf32, #tpu.memory_space<vmem>>, vector<16x256xf32>
      tpu.vector_store %arg16[%c0_112, %c0_113], %140 {strides = array<i32>} : memref<144x256xf32, #tpu.memory_space<vmem>>, vector<16x256xf32>,
      %c16_i32_114 = arith.constant 16 : i32
      %142 = tpu.dynamic_rotate %130 by %c16_i32_114 dim 1 : vector<16x256xf32>, i32 -> vector<16x256xf32>
      %c1_115 = arith.constant 1 : index
      %c0_116 = arith.constant 0 : index
      %143 = vector.load %arg3[%c1_115, %c0_116] : memref<8x256xf32, #tpu.memory_space<vmem>>, vector<1x256xf32>
      %144 = vector.broadcast %143 : vector<1x256xf32> to vector<16x256xf32>
      %145 = arith.mulf %142, %144 : vector<16x256xf32>
      %c16_117 = arith.constant 16 : index
      %c0_118 = arith.constant 0 : index
      %146 = vector.load %arg16[%c16_117, %c0_118] : memref<144x256xf32, #tpu.memory_space<vmem>>, vector<16x256xf32>
      tpu.vector_store %arg16[%c16_117, %c0_118], %145 {strides = array<i32>} : memref<144x256xf32, #tpu.memory_space<vmem>>, vector<16x256xf32>,
      %c15_i32_119 = arith.constant 15 : i32
      %147 = tpu.dynamic_rotate %130 by %c15_i32_119 dim 1 : vector<16x256xf32>, i32 -> vector<16x256xf32>
      %c2_120 = arith.constant 2 : index
      %c0_121 = arith.constant 0 : index
      %148 = vector.load %arg3[%c2_120, %c0_121] : memref<8x256xf32, #tpu.memory_space<vmem>>, vector<1x256xf32>
      %149 = vector.broadcast %148 : vector<1x256xf32> to vector<16x256xf32>
      %150 = arith.mulf %147, %149 : vector<16x256xf32>
      %c32_122 = arith.constant 32 : index
      %c0_123 = arith.constant 0 : index
      %151 = vector.load %arg16[%c32_122, %c0_123] : memref<144x256xf32, #tpu.memory_space<vmem>>, vector<16x256xf32>
      tpu.vector_store %arg16[%c32_122, %c0_123], %150 {strides = array<i32>} : memref<144x256xf32, #tpu.memory_space<vmem>>, vector<16x256xf32>,
      %c1_i32_124 = arith.constant 1 : i32
      %152 = tpu.dynamic_rotate %130 by %c1_i32_124 dim 1 : vector<16x256xf32>, i32 -> vector<16x256xf32>
      %c3_125 = arith.constant 3 : index
      %c0_126 = arith.constant 0 : index
      %153 = vector.load %arg3[%c3_125, %c0_126] : memref<8x256xf32, #tpu.memory_space<vmem>>, vector<1x256xf32>
      %154 = vector.broadcast %153 : vector<1x256xf32> to vector<16x256xf32>
      %155 = arith.mulf %152, %154 : vector<16x256xf32>
      %c48_127 = arith.constant 48 : index
      %c0_128 = arith.constant 0 : index
      %156 = vector.load %arg16[%c48_127, %c0_128] : memref<144x256xf32, #tpu.memory_space<vmem>>, vector<16x256xf32>
      tpu.vector_store %arg16[%c48_127, %c0_128], %155 {strides = array<i32>} : memref<144x256xf32, #tpu.memory_space<vmem>>, vector<16x256xf32>,
      %c64_129 = arith.constant 64 : index
      %c0_130 = arith.constant 0 : index
      %157 = vector.load %arg16[%c64_129, %c0_130] : memref<144x256xf32, #tpu.memory_space<vmem>>, vector<16x256xf32>
      tpu.vector_store %arg16[%c64_129, %c0_130], %130 {strides = array<i32>} : memref<144x256xf32, #tpu.memory_space<vmem>>, vector<16x256xf32>,
      %c255_i32_131 = arith.constant 255 : i32
      %158 = tpu.dynamic_rotate %130 by %c255_i32_131 dim 1 : vector<16x256xf32>, i32 -> vector<16x256xf32>
      %c4_132 = arith.constant 4 : index
      %c0_133 = arith.constant 0 : index
      %159 = vector.load %arg3[%c4_132, %c0_133] : memref<8x256xf32, #tpu.memory_space<vmem>>, vector<1x256xf32>
      %160 = vector.broadcast %159 : vector<1x256xf32> to vector<16x256xf32>
      %161 = arith.mulf %158, %160 : vector<16x256xf32>
      %c80_134 = arith.constant 80 : index
      %c0_135 = arith.constant 0 : index
      %162 = vector.load %arg16[%c80_134, %c0_135] : memref<144x256xf32, #tpu.memory_space<vmem>>, vector<16x256xf32>
      tpu.vector_store %arg16[%c80_134, %c0_135], %161 {strides = array<i32>} : memref<144x256xf32, #tpu.memory_space<vmem>>, vector<16x256xf32>,
      %c241_i32_136 = arith.constant 241 : i32
      %163 = tpu.dynamic_rotate %130 by %c241_i32_136 dim 1 : vector<16x256xf32>, i32 -> vector<16x256xf32>
      %c5_137 = arith.constant 5 : index
      %c0_138 = arith.constant 0 : index
      %164 = vector.load %arg3[%c5_137, %c0_138] : memref<8x256xf32, #tpu.memory_space<vmem>>, vector<1x256xf32>
      %165 = vector.broadcast %164 : vector<1x256xf32> to vector<16x256xf32>
      %166 = arith.mulf %163, %165 : vector<16x256xf32>
      %c96_139 = arith.constant 96 : index
      %c0_140 = arith.constant 0 : index
      %167 = vector.load %arg16[%c96_139, %c0_140] : memref<144x256xf32, #tpu.memory_space<vmem>>, vector<16x256xf32>
      tpu.vector_store %arg16[%c96_139, %c0_140], %166 {strides = array<i32>} : memref<144x256xf32, #tpu.memory_space<vmem>>, vector<16x256xf32>,
      %c240_i32_141 = arith.constant 240 : i32
      %168 = tpu.dynamic_rotate %130 by %c240_i32_141 dim 1 : vector<16x256xf32>, i32 -> vector<16x256xf32>
      %c6_142 = arith.constant 6 : index
      %c0_143 = arith.constant 0 : index
      %169 = vector.load %arg3[%c6_142, %c0_143] : memref<8x256xf32, #tpu.memory_space<vmem>>, vector<1x256xf32>
      %170 = vector.broadcast %169 : vector<1x256xf32> to vector<16x256xf32>
      %171 = arith.mulf %168, %170 : vector<16x256xf32>
      %c112_144 = arith.constant 112 : index
      %c0_145 = arith.constant 0 : index
      %172 = vector.load %arg16[%c112_144, %c0_145] : memref<144x256xf32, #tpu.memory_space<vmem>>, vector<16x256xf32>
      tpu.vector_store %arg16[%c112_144, %c0_145], %171 {strides = array<i32>} : memref<144x256xf32, #tpu.memory_space<vmem>>, vector<16x256xf32>,
      %c239_i32_146 = arith.constant 239 : i32
      %173 = tpu.dynamic_rotate %130 by %c239_i32_146 dim 1 : vector<16x256xf32>, i32 -> vector<16x256xf32>
      %c7_147 = arith.constant 7 : index
      %c0_148 = arith.constant 0 : index
      %174 = vector.load %arg3[%c7_147, %c0_148] : memref<8x256xf32, #tpu.memory_space<vmem>>, vector<1x256xf32>
      %175 = vector.broadcast %174 : vector<1x256xf32> to vector<16x256xf32>
      %176 = arith.mulf %173, %175 : vector<16x256xf32>
      %c128_149 = arith.constant 128 : index
      %c0_150 = arith.constant 0 : index
      %177 = vector.load %arg16[%c128_149, %c0_150] : memref<144x256xf32, #tpu.memory_space<vmem>>, vector<16x256xf32>
      tpu.vector_store %arg16[%c128_149, %c0_150], %176 {strides = array<i32>} : memref<144x256xf32, #tpu.memory_space<vmem>>, vector<16x256xf32>,
      %c0_151 = arith.constant 0 : index
      %c0_152 = arith.constant 0 : index
      %178 = vector.load %arg16[%c0_151, %c0_152] : memref<144x256xf32, #tpu.memory_space<vmem>>, vector<144x256xf32>
      %cst_153 = arith.constant dense<0.000000e+00> : vector<16x256xf32>
      %179 = tpu.matmul %135, %178, %cst_153 {dimension_numbers = #tpu.dot_dimension_numbers<[1], [0], [0], [1], [0, 0, 1, 1], [], []>} : vector<16x144xf32>, vector<144x256xf32>, vector<16x256xf32> -> vector<16x256xf32>
      %180 = vector.broadcast %136 : vector<16x1xf32> to vector<16x256xf32>
      %181 = arith.addf %179, %180 : vector<16x256xf32>
      %182 = arith.addf %181, %1 : vector<16x256xf32>
      %c0_154 = arith.constant 0 : index
      %c0_155 = arith.constant 0 : index
      %c0_156 = arith.constant 0 : index
      %183 = vector.load %arg14[%c0_154, %c0_155, %c0_156] : memref<1x16x256xf32, #tpu.memory_space<vmem>>, vector<1x16x256xf32>
      %184 = vector.shape_cast %183 : vector<1x16x256xf32> to vector<16x256xf32>
      %185 = vector.shape_cast %182 : vector<16x256xf32> to vector<1x16x256xf32>
      tpu.vector_store %arg14[%c0_154, %c0_155, %c0_156], %185 {strides = array<i32>} : memref<1x16x256xf32, #tpu.memory_space<vmem>>, vector<1x16x256xf32>,
    } else {
    }
    return
  }
  func.func @transform_0(%arg0: i32, %arg1: i32) -> (i32, i32, i32) {
    %c0_i32 = arith.constant 0 : i32
    %c0_i32_0 = arith.constant 0 : i32
    %c0_i32_1 = arith.constant 0 : i32
    return %arg0, %c0_i32, %c0_i32_0 : i32, i32, i32
  }
  func.func @transform_1(%arg0: i32, %arg1: i32) -> (i32, i32) {
    %c0_i32 = arith.constant 0 : i32
    %c0_i32_0 = arith.constant 0 : i32
    %c0_i32_1 = arith.constant 0 : i32
    return %c0_i32, %c0_i32_0 : i32, i32
  }
  func.func @transform_2(%arg0: i32, %arg1: i32) -> (i32, i32, i32) {
    %c0_i32 = arith.constant 0 : i32
    %c0_i32_0 = arith.constant 0 : i32
    %c0_i32_1 = arith.constant 0 : i32
    return %arg1, %c0_i32, %c0_i32_0 : i32, i32, i32
  }
  func.func @transform_3(%arg0: i32, %arg1: i32) -> (i32, i32, i32) {
    %c0_i32 = arith.constant 0 : i32
    %c0_i32_0 = arith.constant 0 : i32
    %c0_i32_1 = arith.constant 0 : i32
    return %arg1, %c0_i32, %c0_i32_0 : i32, i32, i32
  }
  func.func @transform_4(%arg0: i32, %arg1: i32) -> (i32, i32, i32) {
    %c0_i32 = arith.constant 0 : i32
    %c0_i32_0 = arith.constant 0 : i32
    %c0_i32_1 = arith.constant 0 : i32
    return %arg1, %c0_i32, %c0_i32_0 : i32, i32, i32
  }
  func.func @transform_5(%arg0: i32, %arg1: i32) -> (i32, i32, i32) {
    %c0_i32 = arith.constant 0 : i32
    %c0_i32_0 = arith.constant 0 : i32
    %c0_i32_1 = arith.constant 0 : i32
    return %arg1, %c0_i32, %c0_i32_0 : i32, i32, i32
  }
  func.func @transform_6(%arg0: i32, %arg1: i32) -> (i32, i32, i32) {
    %c0_i32 = arith.constant 0 : i32
    %c0_i32_0 = arith.constant 0 : i32
    %c0_i32_1 = arith.constant 0 : i32
    return %arg1, %c0_i32, %c0_i32_0 : i32, i32, i32
  }
  func.func @transform_7(%arg0: i32, %arg1: i32) -> (i32, i32, i32) {
    %c0_i32 = arith.constant 0 : i32
    %c0_i32_0 = arith.constant 0 : i32
    %c0_i32_1 = arith.constant 0 : i32
    return %arg1, %c0_i32, %c0_i32_0 : i32, i32, i32
  }
  func.func @transform_8(%arg0: i32, %arg1: i32) -> (i32, i32, i32) {
    %c0_i32 = arith.constant 0 : i32
    %c0_i32_0 = arith.constant 0 : i32
    %c0_i32_1 = arith.constant 0 : i32
    return %arg1, %c0_i32, %c0_i32_0 : i32, i32, i32
  }
  func.func @transform_9(%arg0: i32, %arg1: i32) -> (i32, i32, i32) {
    %c0_i32 = arith.constant 0 : i32
    %c0_i32_0 = arith.constant 0 : i32
    %c0_i32_1 = arith.constant 0 : i32
    return %arg1, %c0_i32, %c0_i32_0 : i32, i32, i32
  }
  func.func @transform_10(%arg0: i32, %arg1: i32) -> (i32, i32) {
    %c0_i32 = arith.constant 0 : i32
    %c0_i32_0 = arith.constant 0 : i32
    %c0_i32_1 = arith.constant 0 : i32
    return %c0_i32, %c0_i32_0 : i32, i32
  }
  func.func @transform_11(%arg0: i32, %arg1: i32) -> (i32, i32) {
    %c0_i32 = arith.constant 0 : i32
    %c0_i32_0 = arith.constant 0 : i32
    %c0_i32_1 = arith.constant 0 : i32
    return %c0_i32, %c0_i32_0 : i32, i32
  }
  func.func @transform_12(%arg0: i32, %arg1: i32) -> (i32, i32, i32) {
    %c0_i32 = arith.constant 0 : i32
    %c0_i32_0 = arith.constant 0 : i32
    %c0_i32_1 = arith.constant 0 : i32
    return %arg0, %c0_i32, %c0_i32_0 : i32, i32, i32
  }
}

</mosaic_0001>

<bundles_post_ra>
// kernel: tpu_custom_call.1
= control target key start
LH: loop header
LB: loop body
LE: loop exit
PB: predicated region body
PF: predicated region fallthrough
CT: control target
= control target key end

     0   :  { %s3648_s0 = inlined_call_operand.vmem [shape: f32[2,16,256], index: 0, kind: input, shape index: {}]   ;;  %s3649_s1 = inlined_call_operand.hbm [shape: f32[8,256], index: 1, kind: input, shape index: {}]   ;;  %s3650_s2 = inlined_call_operand.vmem [shape: f32[2,16,144], index: 2, kind: input, shape index: {}]   ;;  %s3651_s3 = inlined_call_operand.vmem [shape: f32[2,16,1], index: 3, kind: input, shape index: {}]   ;;  %s3652_s4 = inlined_call_operand.hbm [shape: f32[2,16,144], index: 4, kind: input, shape index: {}]   ;;  %s3653_s5 = inlined_call_operand.vmem [shape: f32[2,16,1], index: 5, kind: input, shape index: {}]   ;;  %s3654_s6 = inlined_call_operand.vmem [shape: f32[2,4,16], index: 6, kind: input, shape index: {}]   ;;  %s3655_s7 = inlined_call_operand.vmem [shape: f32[2,4,1], index: 7, kind: input, shape index: {}]   ;;  %s3656_s8 = inlined_call_operand.vmem [shape: f32[2,16,4], index: 8, kind: input, shape index: {}]   ;;  %s3657_s9 = inlined_call_operand.vmem [shape: f32[2,16,1], index: 9, kind: input, shape index: {}]   ;;  %s3658_s10 = inlined_call_operand.vmem [shape: f32[16,144], index: 10, kind: input, shape index: {}]   ;;  %s3659_s11 = inlined_call_operand.vmem [shape: f32[16,1], index: 11, kind: input, shape index: {}]   ;;  %s3660_s12 = inlined_call_operand.hbm [shape: f32[2,16,256], index: 12, kind: output, shape index: {}]  }
   0x1   :  { %3675 = sst [smem:[#allocation19_spill]] %s3649_s1 }
   0x2   :  { %3676 = sst [smem:[#allocation20_spill]] %s3653_s5 }
   0x3   :  { %3677 = sst [smem:[#allocation21_spill]] %s3654_s6 }
   0x4   :  { %3678 = sst [smem:[#allocation22_spill]] %s3655_s7 }
   0x5   :  { %3679 = sst [smem:[#allocation23_spill]] %s3656_s8 }
   0x6   :  { %3680 = sst [smem:[#allocation24_spill]] %s3657_s9 }
   0x7   :  { %3681 = sst [smem:[#allocation25_spill]] %s3658_s10 }
   0x8   :  { %3682 = sst [smem:[#allocation26_spill]] %s3659_s11 }
   0x9   :  { %3683 = sst [smem:[#allocation27_spill]] %s3660_s12 }
   0xa   :  { %17 = vsyncpa [#allocation5], 0 }
   0xb   :  { %18 = vsyncpa [#allocation8], 0 }
   0xc   :  { %20 = vsyncpa [#allocation8 + $0x1], 0 }
   0xd   :  { %21 = vsyncpa [#allocation6], 0 }
   0xe   :  { %23 = vsyncpa [#allocation6 + $0x1], 0  ;;  %s2786_s21 = smov 0   ;;  %s2788_s22 = smov 0  }
   0xf   :  { %s2790_s23 = smov 0   ;;  %s2792_s24 = smov 0  }
  0x10   :  { %s2794_s25 = smov 0   ;;  %s2796_s26 = smov 0  }
  0x11   :  { %s2798_s27 = smov 0   ;;  %s2800_s28 = smov 0  }
  0x12   :  { %s2802_s29 = smov 0   ;;  %s2804_s30 = smov 0  }
  0x13   :  { %s2806_s13 = smov 0  }
  0x14 LB: > { %3684 = sst [smem:[#allocation13_spill]] %s2653_s21  ;;  %s2261_s14 = sadd.s32 4294967295, %s2693_s13   ;;  %s2693_s13 = sphi %s2806_s13, %s29_s13   ;;  %s2689_s30 = sphi %s2804_s30, %s3730_s30   ;;  %s2685_s29 = sphi %s2802_s29, %s3729_s29   ;;  %s2681_s28 = sphi %s2800_s28, %s3728_s28   ;;  %s2677_s27 = sphi %s2798_s27, %s3727_s27   ;;  %s2673_s26 = sphi %s2796_s26, %s3726_s26   ;;  %s2669_s25 = sphi %s2794_s25, %s3725_s25   ;;  %s2665_s24 = sphi %s2792_s24, %s3724_s24   ;;  %s2661_s23 = sphi %s2790_s23, %s3723_s23   ;;  %s2657_s22 = sphi %s2788_s22, %s3722_s22   ;;  %s2653_s21 = sphi %s2786_s21, %s3721_s21  }
  0x15   : > { %3685 = sst [smem:[#allocation14_spill]] %s2693_s13  ;;  %s2262_s15 = sadd.s32 4294967294, %s2693_s13  }
  0x16   : > { %p154_p0 = scmp.ne.s32.totalorder %s2673_s26, %s2669_s25  ;;  %p155_p1 = scmp.eq.s32.totalorder %s2693_s13, 0 }
  0x17   : > { %p160_p2 = scmp.ne.s32.totalorder %s2669_s25, %s2665_s24  ;;  %p2846_p3 = scmp.eq.s32.totalorder %s2261_s14, 0 }
  0x18   : > { %p2851_p4 = por %p155_p1, %p154_p0  ;;  %p355_p5 = scmp.ne.s32.totalorder %s2661_s23, %s2657_s22 }
  0x19   : > { %p2859_p6 = por %p2846_p3, %p160_p2  ;;  %p356_p7 = scmp.eq.s32.totalorder %s2261_s14, 3 }
  0x1a   : > { %p361_p8 = scmp.ne.s32.totalorder %s2657_s22, %s2653_s21  ;;  %p362_p9 = scmp.eq.s32.totalorder %s2262_s15, 3 }
  0x1b   : > { %s3688_s20 = scalar_select %p2859_p6, 1, 0 }
  0x1c   : > { %p2865_p10 = por %p356_p7, %p355_p5  ;;  %p2263_p11 = scmp.ge.s32.totalorder %s2693_s13, 1 }
  0x1d   : > { %p2870_p12 = por %p362_p9, %p361_p8  ;;  %p369_p13 = scmp.lt.s32.totalorder %s2693_s13, 5 }
  0x1e   : > { %s3689_s24 = scalar_select %p2865_p10, 1, 0 }
  0x1f   : > { %s3691_s18 = scalar_select %p2870_p12, 1, 0 }
  0x20   : > { %3690 = sst [smem:[#allocation15_spill]] %s3689_s24  ;;  %p2875_p0 = pnand %p2263_p11, %p369_p13 }
  0x21   : > { %3692 = sst [smem:[#allocation16_spill]] %s3691_s18  ;;  %s2695_s12 = smov [#allocation4]  }
  0x22   : > { %s3693_s16 = scalar_select %p2875_p0, 1, 0 }
  0x23   : > { %s382_s11 = sshll.u32 %s2695_s12, 4  ;;  %p2375_p1 = pneg %p2875_p0  ;;  %s383_s11 = int_to_ptr.vmem [resolvable:$true] %s382_s11 }
  0x24   : > { %p2388_p2 = scmp.lt.s32.totalorder %s2693_s13, 4  ;;  %s2526_s15 = scalar_lea.vmem %s383_s11, 256 }
  0x25   : > { %p2376_p5 = pnand %p2375_p1, %p2846_p3  ;;  %p2527_p9 = scmp.ne.s32.totalorder %s383_s11, %s2526_s15 }
  0x26   : > { %p2886_p7 = pnand %p2388_p2, %p2851_p4  ;;  %p2534_p12 = scmp.lt.s32.totalorder %s383_s11, %s383_s11 }
  0x27   : > { %p2517_p8 = pneg %p2376_p5  ;;  %p2535_p10 = scmp.lt.s32.totalorder %s2526_s15, %s2526_s15 }
  0x29   : > { %p2529_p11 = pnand %p2527_p9, %p2517_p8  ;;  %p2536_p6 = por %p2535_p10, %p2534_p12 }
  0x2b   : > { %p2530_p13 = pneg %p2529_p11 }
  0x2d   : > { %p2537_p0 = pnand %p2536_p6, %p2530_p13 }
  0x2f   : > { %2540 = shalt.err (!%p2537_p0)
}
  0x30   : > { %s3695_s1 = sld [smem:[#allocation19_spill]]  ;;  %s38_s19 = sadd.s32 1, %s2685_s29 }
  0x31   : > { %s41_s21 = sadd.s32 1, %s2689_s30  ;;  %p39_p4 = scmp.ge.s32.totalorder %s38_s19, 2 }
  0x32   : > { %s423_s15 = sand.u32 1, %s2673_s26   ;;  %s2305_s12 = sshll.u32 %s2685_s29, 9 }
  0x33   : > { %s2266_s13 = sshll.u32 %s423_s15, 5  ;;  %s3732_s19 = smov (%p39_p4, %s38_s19), 0 }
  0x34   : > { %3696 = sst [smem:[#allocation17_spill]] %s3732_s19  ;;  %s3734_s21 = smov (!%p39_p4, %s41_s21), %s2689_s30 }
  0x35   : > { %s144_s18 = ssub.s32 %s2685_s29, %s3732_s19  ;;  %p43_p6 = scmp.ge.s32.totalorder %s3734_s21, 2 }
  0x36   : > { %2378 = dma.hbm_to_vmem [thread:$0]  (!%p2376_p5), %s3695_s1, 256, %s383_s11, [#allocation5]  }
  0x37   : > { %p145_p10 = scmp.eq.s32.totalorder %s144_s18, 0  ;;  %s427_s24 = scalar_lea.vmem [#allocation7], %s2266_s13 }
  0x38   : > { %s434_s10 = sshll.u32 %s427_s24, 4  ;;  %s3736_s21 = smov (%p43_p6, %s3734_s21), 0  ;;  %s435_s10 = int_to_ptr.vmem [resolvable:$true] %s434_s10 }
  0x39   : > { %3697 = sst [smem:[#allocation18_spill]] %s3736_s21  ;;  %s3698_s11 = sadd.s32 1, %s2673_s26 }
  0x3a   : > { %s2907_s1 = scalar_select %p145_p10, %s2673_s26, %s3698_s11  }
  0x3b   : > { %s342_s9 = ssub.s32 %s2689_s30, %s3736_s21  ;;  %s433_s6 = scalar_lea.hbm %s3652_s4, %s2305_s12 }
  0x3c   : > { %p343_p12 = scmp.eq.s32.totalorder %s342_s9, 0  ;;  %s3699_s5 = sadd.s32 1, %s2661_s23 }
  0x3d   : > { %s424_s18 = scalar_lea.sflag [#allocation8], %s423_s15  ;;  %p2543_p0 = pneg %p2886_p7 }
  0x3e   : > { %s2917_s19 = scalar_select %p343_p12, %s2661_s23, %s3699_s5  }
  0x3f   : > { %s2554_s13 = scalar_lea.vmem %s435_s10, 512  ;;  %s2696_s24 = smov [#allocation7]  }
  0x40   : > { %p2555_p1 = scmp.ne.s32.totalorder %s435_s10, %s2554_s13  ;;  %s2559_s11 = sshll.u32 %s2696_s24, 4  ;;  %s2560_s11 = int_to_ptr.vmem [resolvable:$false] %s2559_s11 }
  0x41   : > { %s2561_s21 = scalar_lea.vmem %s2560_s11, 1024  ;;  %p2562_p8 = scmp.lt.s32.totalorder %s435_s10, %s2560_s11 }
  0x42   : > { %p2557_p2 = pnand %p2555_p1, %p2543_p0  ;;  %p2563_p9 = scmp.lt.s32.totalorder %s2561_s21, %s2554_s13 }
  0x44   : > { %p2558_p5 = pneg %p2557_p2  ;;  %p2564_p11 = por %p2563_p9, %p2562_p8 }
  0x46   : > { %p2565_p13 = pnand %p2564_p11, %p2558_p5 }
  0x48   : > { %2568 = shalt.err (!%p2565_p13)
}
  0x49   : > { %s2697_s7 = smov 256   ;;  %s2698_s5 = smov 16  }
  0x4a   : > { %2382 = dma.hbm_to_vmem [thread:$0]  (!%p2886_p7), %s433_s6, 512, %s435_s10, %s424_s18, %s2697_s7, %s2697_s7, %s2698_s5  }
  0x4b   : > { %p3700_p4 = scmp.ne.s32.totalorder %s3693_s16, 0 }
  0x4d   : > { %484 = sbr.rel (%p3700_p4) target bundleno = 1964 (0x7ac), region = 68 }
  0x52   : > { %2640 = dma.done.wait (%p2846_p3), [#allocation5], 256  }
  0x53   : > { %2642 = vsyncadd (%p2846_p3), [#allocation5], 4294967040  ;;  %s490_s8 = sand.u32 1, %s2669_s25   ;;  %p3701_p6 = scmp.ne.s32.totalorder %s3688_s20, 0 }
  0x54   : > { %s2271_s9 = sshll.u32 %s490_s8, 5  ;;  %s491_s21 = scalar_lea.sflag [#allocation8], %s490_s8 }
  0x55   : > { %s2930_s15 = scalar_lea.vmem [#allocation7], %s2271_s9 }
  0x56   : > { %2644 = dma.done.wait (%p3701_p6), %s491_s21, 512  }
  0x57   : > { %2646 = vsyncadd (%p3701_p6), %s491_s21, 4294966784  ;;  %p573_p7 = scmp.lt.s32.totalorder %s2681_s28, 1  ;;  %p615_p10 = scmp.eq.s32.totalorder %s2677_s27, 0  ;;  %v618_v3 = vld [vmem:[#allocation2 + $0x18] sm:$0xff]  ;;  %v616_v6 = vld [vmem:[#allocation2 + $0x10] sm:$0xff]  ;;  %vm956_vm1 = vcmask 130048   ;;  %v641_v18 = vlaneseq }
  0x58   : > { %v619_v8 = vld [vmem:[#allocation2 + $0x8] sm:$0xff]  ;;  %s2699_s20 = smov 112   ;;  %v617_v11 = vld [vmem:[#allocation2] sm:$0xff]  ;;  %s570_s18 = sand.u32 1, %s2657_s22   ;;  %v2707_v15 = vmov 0   ;;  %vm2709_vm10 = vmmov 0  }
  0x59   : > { %s574_s6 = scalar_select %p573_p7, %s2681_s28, 1  ;;  %2504 = vset.pattern.permute.xlu1 %v2707_v15  ;;  %2503 = vset.pattern.permute.xlu0 %v2707_v15  ;;  %v651_v19 = vshrl.u32 %v641_v18, 7  ;;  %v3062_v20 = vand.u32 127, %v641_v18  ;;  %v856_v23 = vld [vmem:[#allocation4 + $0x6] ss:$8 sm:$0x3] }
  0x5a   : > { %s620_s10 = scalar_select %p615_p10, 1, 0  ;;  %v822_v29 = vld [vmem:[#allocation4 + $0x5] ss:$8 sm:$0x3]  ;;  %vm1528_vm11 = vcmask 31744  }
  0x5b   : > { %s2306_s16 = sshll.u32 %s574_s6, 5  ;;  %s2981_s13 = sshll.u32 %s570_s18, 5  ;;  %v3064_v21 = vsub.s32 0, %v651_v19  ;;  %v3066_v22 = vsub.s32 1, %v651_v19  ;;  %vm850_vm2 = vcmp.lt.s32.totalorder %v3062_v20, 112  ;;  %vm816_vm3 = vcmp.lt.s32.totalorder %v3062_v20, 113 }
  0x5c   : > { %s577_s12 = scalar_lea.vmem %s3648_s0, %s2306_s16  ;;  %v621_v0 = vstv %s620_s10  ;;  %s2700_s24 = smov 113   ;;  %v788_v48 = vld [vmem:[#allocation4 + $0x4] ss:$8 sm:$0x3]  ;;  %vm782_vm4 = vcmp.lt.s32.totalorder %v3062_v20, 127  ;;  %vm744_vm5 = vcmp.lt.s32.totalorder %v3062_v20, 1 }
  0x5d   : > { %vm2942_vm0 = vcmp.eq.s32.totalorder %v621_v0, 1  ;;  %v2946_v2 = vld [vmem:[%s577_s12 + $0x10] sm:$0xff]  ;;  %v2948_v4 = vld [vmem:[%s577_s12] sm:$0xff]  ;;  %v2955_v7 = vld [vmem:[%s577_s12 + $0x18] sm:$0xff]  ;;  %s2701_s11 = smov 127   ;;  %s2702_s7 = smov 1   ;;  %v861_v26 = vrot.slane %v856_v23, %v3064_v21  ;;  %v865_v27 = vrot.slane %v856_v23, %v3066_v22  ;;  %v827_v37 = vrot.slane %v822_v29, %v3064_v21 }
  0x5e   : > { %v2953_v5 = vsel %vm2942_vm0, %v2946_v2, %v618_v3  ;;  %v2962_v9 = vsel %vm2942_vm0, %v2948_v4, %v616_v6  ;;  %v2964_v10 = vld [vmem:[%s577_s12 + $0x8] sm:$0xff]  ;;  %v2971_v12 = vsel %vm2942_vm0, %v2955_v7, %v619_v8  ;;  %s2703_s5 = smov 15   ;;  %s2704_s8 = smov 16   ;;  %v831_v38 = vrot.slane %v822_v29, %v3066_v22 }
  0x5f   : > { %844 = vrot.lane.b32.xlu0 %v2953_v5, %s2699_s20  ;;  %842 = vrot.lane.b32.xlu1 %v2962_v9, %s2699_s20  ;;  %v2977_v13 = vsel %vm2942_vm0, %v2964_v10, %v617_v11  ;;  %p578_p3 = scmp.lt.s32.totalorder %s2677_s27, 1  ;;  %s2705_s21 = smov 17   ;;  %v793_v54 = vrot.slane %v788_v48, %v3064_v21  ;;  %v797_v55 = vrot.slane %v788_v48, %v3066_v22  ;;  %v750_v3 = vld [vmem:[#allocation4 + $0x3] ss:$8 sm:$0x3]  ;;  %vm710_vm6 = vcmp.lt.s32.totalorder %v3062_v20, 15 }
  0x60   : > { %s2706_s14 = smov 111   ;;  %v716_v23 = vld [vmem:[#allocation4 + $0x2] ss:$8 sm:$0x3]  ;;  %vm676_vm7 = vcmp.lt.s32.totalorder %v3062_v20, 16  ;;  %vm643_vm8 = vcmp.lt.s32.totalorder %v3062_v20, 17 }
  0x61   : > { %s3029_s9 = scalar_select %p578_p3, %s2677_s27, 1  ;;  %vm884_vm9 = vcmp.lt.s32.totalorder %v3062_v20, 111  ;;  %vm1535_vm12 = vcmask 1043456  }
  0x62   : > { %p2297_p12 = scmp.ne.s32.totalorder %s2677_s27, 1 }
  0x63   : > { %848 = vrot.lane.b32.xlu0 %v2971_v12, %s2699_s20  ;;  %846 = vrot.lane.b32.xlu1 %v2977_v13, %s2699_s20  ;;  %s2307_s6 = sshll.u32 %s3029_s9, 5  ;;  %s3052_s12 = sshll.u32 %s3029_s9, 4 }
  0x64   : > { %s3039_s17 = scalar_lea.vmem %s3650_s2, %s2307_s6  ;;  %s587_s16 = scalar_lea.vmem %s3651_s3, %s3052_s12 }
  0x65   : > { %v628_v14 = vld [vmem:[%s3039_s17 + $0x8] sm:$0xff]  ;;  %v631_v17 = vld [vmem:[%s587_s16] sm:$0xff]  ;;  %s2711_s6 = smov (!%p2297_p12), 113   ;;  %s2712_s27 = smov (!%p2297_p12), 127  }
  0x66   : > { %2287 = vmatprep.mubr.msk.f32.mxu0 %vm956_vm1, %v628_v14  ;;  %v632_v16 = vld [vmem:[%s587_s16 + $0x8] sm:$0xff]  ;;  %v759_v14 = vrot.slane %v750_v3, %v3066_v22  ;;  %s3706_s16 = sld [smem:[#allocation23_spill]]  ;;  %s2714_s10 = smov (!%p2297_p12), 15  }
  0x67   : > { %810 = vrot.lane.b32.xlu0 %v2953_v5, %s2700_s24  ;;  %814 = vrot.lane.b32.xlu1 %v2971_v12, %s2700_s24 }
  0x6b   : > { %808 = vrot.lane.b32.xlu0 %v2962_v9, %s2700_s24  ;;  %812 = vrot.lane.b32.xlu1 %v2977_v13, %s2700_s24 }
  0x6f   : > { %776 = vrot.lane.b32.xlu0 %v2953_v5, %s2701_s11  ;;  %780 = vrot.lane.b32.xlu1 %v2971_v12, %s2701_s11 }
  0x73   : > { %774 = vrot.lane.b32.xlu0 %v2962_v9, %s2701_s11  ;;  %778 = vrot.lane.b32.xlu1 %v2977_v13, %s2701_s11 }
  0x77   : > { %738 = vrot.lane.b32.xlu0 %v2953_v5, %s2702_s7  ;;  %742 = vrot.lane.b32.xlu1 %v2971_v12, %s2702_s7 }
  0x7b   : > { %736 = vrot.lane.b32.xlu0 %v2962_v9, %s2702_s7  ;;  %740 = vrot.lane.b32.xlu1 %v2977_v13, %s2702_s7 }
  0x7f   : > { %704 = vrot.lane.b32.xlu0 %v2953_v5, %s2703_s5  ;;  %708 = vrot.lane.b32.xlu1 %v2971_v12, %s2703_s5 }
  0x83   : > { %702 = vrot.lane.b32.xlu0 %v2962_v9, %s2703_s5  ;;  %706 = vrot.lane.b32.xlu1 %v2977_v13, %s2703_s5 }
  0x87   : > { %670 = vrot.lane.b32.xlu0 %v2953_v5, %s2704_s8  ;;  %674 = vrot.lane.b32.xlu1 %v2971_v12, %s2704_s8 }
  0x8b   : > { %668 = vrot.lane.b32.xlu0 %v2962_v9, %s2704_s8  ;;  %672 = vrot.lane.b32.xlu1 %v2977_v13, %s2704_s8 }
  0x8f   : > { %635 = vrot.lane.b32.xlu0 %v2953_v5, %s2705_s21  ;;  %639 = vrot.lane.b32.xlu1 %v2971_v12, %s2705_s21 }
  0x93   : > { %633 = vrot.lane.b32.xlu0 %v2962_v9, %s2705_s21  ;;  %637 = vrot.lane.b32.xlu1 %v2977_v13, %s2705_s21 }
  0x97   : > { %878 = vrot.lane.b32.xlu0 %v2953_v5, %s2706_s14  ;;  %882 = vrot.lane.b32.xlu1 %v2971_v12, %s2706_s14 }
  0x9b   : > { %876 = vrot.lane.b32.xlu0 %v2962_v9, %s2706_s14  ;;  %880 = vrot.lane.b32.xlu1 %v2977_v13, %s2706_s14 }
  0x9f   : > { %953 = vperm.xlu0 %2503, %v632_v16   ;;  %948 = vperm.xlu1 %2504, %v631_v17   ;;  %v755_v16 = vrot.slane %v750_v3, %v3064_v21 }
  0xd1   : > { %v845_v24 = vpop.permute.xlu0 %844  ;;  %v843_v25 = vpop.permute.xlu1 %842 }
  0xd5   : > { %v849_v28 = vpop.permute.xlu0 %848  ;;  %v847_v32 = vpop.permute.xlu1 %846 }
  0xd6   : > { %v852_v30 = vsel %vm850_vm2, %v845_v24, %v849_v28  ;;  %v854_v31 = vsel %vm850_vm2, %v849_v28, %v845_v24  ;;  %v851_v35 = vsel %vm850_vm2, %v843_v25, %v847_v32  ;;  %v853_v36 = vsel %vm850_vm2, %v847_v32, %v843_v25 }
  0xd7   : > { %v870_v33 = vmul.f32 %v861_v26, %v852_v30  ;;  %v871_v34 = vmul.f32 %v865_v27, %v854_v31  ;;  %v869_v39 = vmul.f32 %v865_v27, %v853_v36  ;;  %v868_v41 = vmul.f32 %v861_v26, %v851_v35 }
  0xd8   : > { %v721_v31 = vrot.slane %v716_v23, %v3064_v21  ;;  %v725_v32 = vrot.slane %v716_v23, %v3066_v22 }
  0xd9   : > { %v811_v40 = vpop.permute.xlu0 %810  ;;  %963 = vmatprep.subr.mxu0 %v871_v34  ;;  %v815_v42 = vpop.permute.xlu1 %814 }
  0xda   : > { %964 = vmatpush1.msra.mxu0 %v870_v33  ;;  %v818_v43 = vsel %vm816_vm3, %v811_v40, %v815_v42  ;;  %v820_v44 = vsel %vm816_vm3, %v815_v42, %v811_v40  ;;  %v682_v40 = vld [vmem:[#allocation4 + $0x1] ss:$8 sm:$0x3] }
  0xdb   : > { %965 = vmatprep.subr.mxu0 %v869_v39  ;;  %v836_v45 = vmul.f32 %v827_v37, %v818_v43  ;;  %v837_v46 = vmul.f32 %v831_v38, %v820_v44 }
  0xdc   : > { %966 = vmatpush1.msra.mxu0 %v868_v41 }
  0xdd   : > { %v809_v47 = vpop.permute.xlu0 %808  ;;  %v813_v49 = vpop.permute.xlu1 %812  ;;  %967 = vmatprep.subr.mxu0 %v837_v46  ;;  %v687_v46 = vrot.slane %v682_v40, %v3064_v21 }
  0xde   : > { %v817_v50 = vsel %vm816_vm3, %v809_v47, %v813_v49  ;;  %v819_v51 = vsel %vm816_vm3, %v813_v49, %v809_v47  ;;  %968 = vmatpush1.msra.mxu0 %v836_v45  ;;  %v691_v47 = vrot.slane %v682_v40, %v3066_v22 }
  0xdf   : > { %v834_v52 = vmul.f32 %v827_v37, %v817_v50  ;;  %v835_v53 = vmul.f32 %v831_v38, %v819_v51 }
  0xe1   : > { %v777_v56 = vpop.permute.xlu0 %776  ;;  %v781_v57 = vpop.permute.xlu1 %780  ;;  %969 = vmatprep.subr.mxu0 %v835_v53 }
  0xe2   : > { %v784_v58 = vsel %vm782_vm4, %v777_v56, %v781_v57  ;;  %v786_v59 = vsel %vm782_vm4, %v781_v57, %v777_v56  ;;  %970 = vmatpush1.msra.mxu0 %v834_v52 }
  0xe3   : > { %v802_v60 = vmul.f32 %v793_v54, %v784_v58  ;;  %v803_v61 = vmul.f32 %v797_v55, %v786_v59 }
  0xe5   : > { %v775_v62 = vpop.permute.xlu0 %774  ;;  %v779_v63 = vpop.permute.xlu1 %778  ;;  %971 = vmatprep.subr.mxu0 %v803_v61 }
  0xe6   : > { %v783_v0 = vsel %vm782_vm4, %v775_v62, %v779_v63  ;;  %v785_v1 = vsel %vm782_vm4, %v779_v63, %v775_v62  ;;  %972 = vmatpush1.msra.mxu0 %v802_v60 }
  0xe7   : > { %v800_v6 = vmul.f32 %v793_v54, %v783_v0  ;;  %v801_v8 = vmul.f32 %v797_v55, %v785_v1  ;;  %v648_v55 = vld [vmem:[#allocation4] ss:$8 sm:$0x3] }
  0xe8   : > { %v653_v61 = vrot.slane %v648_v55, %v3064_v21  ;;  %v657_v62 = vrot.slane %v648_v55, %v3066_v22 }
  0xe9   : > { %v739_v11 = vpop.permute.xlu0 %738  ;;  %v743_v15 = vpop.permute.xlu1 %742  ;;  %973 = vmatprep.subr.mxu0 %v801_v8 }
  0xea   : > { %v746_v17 = vsel %vm744_vm5, %v739_v11, %v743_v15  ;;  %974 = vmatpush1.msra.mxu0 %v800_v6  ;;  %v748_v18 = vsel %vm744_vm5, %v743_v15, %v739_v11 }
  0xeb   : > { %975 = vmatprep.subr.mxu0 %v2971_v12  ;;  %v765_v24 = vmul.f32 %v759_v14, %v746_v17  ;;  %v764_v26 = vmul.f32 %v755_v16, %v748_v18 }
  0xec   : > { %976 = vmatpush1.msra.mxu0 %v2953_v5 }
  0xed   : > { %v737_v19 = vpop.permute.xlu0 %736  ;;  %v741_v25 = vpop.permute.xlu1 %740  ;;  %977 = vmatprep.subr.mxu0 %v2977_v13 }
  0xee   : > { %v745_v27 = vsel %vm744_vm5, %v737_v19, %v741_v25  ;;  %v747_v28 = vsel %vm744_vm5, %v741_v25, %v737_v19  ;;  %978 = vmatpush1.msra.mxu0 %v2962_v9 }
  0xef   : > { %v762_v29 = vmul.f32 %v755_v16, %v747_v28  ;;  %v763_v30 = vmul.f32 %v759_v14, %v745_v27  ;;  %979 = vmatprep.subr.mxu0 %v765_v24  ;;  %v890_v14 = vld [vmem:[#allocation4 + $0x7] ss:$8 sm:$0x3] }
  0xf0   : > { %980 = vmatpush1.msra.mxu0 %v764_v26  ;;  %v895_v23 = vrot.slane %v890_v14, %v3064_v21  ;;  %v899_v24 = vrot.slane %v890_v14, %v3066_v22  ;;  %v1194_v14 = vld [vmem:[#allocation4 + $0x4] ss:$8 sm:$0x3] }
  0xf1   : > { %v705_v33 = vpop.permute.xlu0 %704  ;;  %v709_v34 = vpop.permute.xlu1 %708  ;;  %981 = vmatprep.subr.mxu0 %v763_v30 }
  0xf2   : > { %v712_v35 = vsel %vm710_vm6, %v705_v33, %v709_v34  ;;  %v714_v36 = vsel %vm710_vm6, %v709_v34, %v705_v33  ;;  %982 = vmatpush1.msra.mxu0 %v762_v29 }
  0xf3   : > { %v730_v37 = vmul.f32 %v721_v31, %v714_v36  ;;  %v731_v38 = vmul.f32 %v725_v32, %v712_v35 }
  0xf5   : > { %v703_v39 = vpop.permute.xlu0 %702  ;;  %v707_v41 = vpop.permute.xlu1 %706  ;;  %983 = vmatprep.subr.mxu0 %v731_v38  ;;  %v630_v38 = vld [vmem:[%s3039_s17 + $0x18] sm:$0xff] }
  0xf6   : > { %v711_v42 = vsel %vm710_vm6, %v703_v39, %v707_v41  ;;  %v713_v43 = vsel %vm710_vm6, %v707_v41, %v703_v39  ;;  %984 = vmatpush1.msra.mxu0 %v730_v37  ;;  %v627_v37 = vld [vmem:[%s3039_s17] sm:$0xff]  ;;  %v629_v39 = vld [vmem:[%s3039_s17 + $0x10] sm:$0xff]  ;;  %s3705_s17 = sld [smem:[#allocation21_spill]] }
  0xf7   : > { %v728_v44 = vmul.f32 %v721_v31, %v713_v43  ;;  %v729_v45 = vmul.f32 %v725_v32, %v711_v42 }
  0xf9   : > { %v671_v48 = vpop.permute.xlu0 %670  ;;  %v675_v49 = vpop.permute.xlu1 %674  ;;  %985 = vmatprep.subr.mxu0 %v729_v45 }
  0xfa   : > { %v678_v50 = vsel %vm676_vm7, %v671_v48, %v675_v49  ;;  %v680_v51 = vsel %vm676_vm7, %v675_v49, %v671_v48  ;;  %986 = vmatpush1.msra.mxu0 %v728_v44 }
  0xfb   : > { %v696_v52 = vmul.f32 %v687_v46, %v680_v51  ;;  %v697_v53 = vmul.f32 %v691_v47, %v678_v50 }
  0xfd   : > { %v669_v54 = vpop.permute.xlu0 %668  ;;  %v673_v56 = vpop.permute.xlu1 %672  ;;  %987 = vmatprep.subr.mxu0 %v697_v53 }
  0xfe   : > { %v677_v57 = vsel %vm676_vm7, %v669_v54, %v673_v56  ;;  %v679_v58 = vsel %vm676_vm7, %v673_v56, %v669_v54  ;;  %988 = vmatpush1.msra.mxu0 %v696_v52  ;;  %v1045_v54 = vld [vmem:[%s2930_s15 + $0x8] sm:$0xff] }
  0xff   : > { %v694_v59 = vmul.f32 %v687_v46, %v679_v58  ;;  %v695_v60 = vmul.f32 %v691_v47, %v677_v57  ;;  %2289 = vmatprep.mubr.msk.f32.mxu1 %vm956_vm1, %v1045_v54  ;;  %v1258_v57 = vld [vmem:[#allocation4 + $0x6] ss:$8 sm:$0x3] }
 0x101   : > { %v636_v63 = vpop.permute.xlu0 %635  ;;  %v640_v0 = vpop.permute.xlu1 %639  ;;  %989 = vmatprep.subr.mxu0 %v695_v60  ;;  %v1267_v60 = vrot.slane %v1258_v57, %v3066_v22 }
 0x102   : > { %v645_v1 = vsel %vm643_vm8, %v636_v63, %v640_v0  ;;  %v647_v3 = vsel %vm643_vm8, %v640_v0, %v636_v63  ;;  %990 = vmatpush1.msra.mxu0 %v694_v59  ;;  %v1263_v59 = vrot.slane %v1258_v57, %v3064_v21 }
 0x103   : > { %v662_v6 = vmul.f32 %v653_v61, %v647_v3  ;;  %v663_v8 = vmul.f32 %v657_v62, %v645_v1 }
 0x105   : > { %v634_v11 = vpop.permute.xlu0 %633  ;;  %v638_v15 = vpop.permute.xlu1 %637  ;;  %991 = vmatprep.subr.mxu0 %v663_v8 }
 0x106   : > { %v644_v16 = vsel %vm643_vm8, %v634_v11, %v638_v15  ;;  %v646_v17 = vsel %vm643_vm8, %v638_v15, %v634_v11  ;;  %992 = vmatpush1.msra.mxu0 %v662_v6 }
 0x107   : > { %v660_v18 = vmul.f32 %v653_v61, %v646_v17  ;;  %v661_v19 = vmul.f32 %v657_v62, %v644_v16  ;;  %v1226_v61 = vld [vmem:[#allocation4 + $0x5] ss:$8 sm:$0x3] }
 0x108   : > { %v1231_v8 = vrot.slane %v1226_v61, %v3064_v21  ;;  %v1235_v11 = vrot.slane %v1226_v61, %v3066_v22 }
 0x109   : > { %v879_v25 = vpop.permute.xlu0 %878  ;;  %v883_v26 = vpop.permute.xlu1 %882  ;;  %993 = vmatprep.subr.mxu0 %v661_v19 }
 0x10a   : > { %v886_v27 = vsel %vm884_vm9, %v879_v25, %v883_v26  ;;  %v888_v28 = vsel %vm884_vm9, %v883_v26, %v879_v25  ;;  %994 = vmatpush1.msra.mxu0 %v660_v18  ;;  %v1203_v25 = vrot.slane %v1194_v14, %v3066_v22  ;;  %v1158_v26 = vld [vmem:[#allocation4 + $0x3] ss:$8 sm:$0x3] }
 0x10b   : > { %v904_v29 = vmul.f32 %v895_v23, %v886_v27  ;;  %v905_v30 = vmul.f32 %v899_v24, %v888_v28 }
 0x10d   : > { %v877_v31 = vpop.permute.xlu0 %876  ;;  %v881_v32 = vpop.permute.xlu1 %880  ;;  %1023 = vmatprep.subr.mxu0 %v905_v30 }
 0x10e   : > { %v885_v33 = vsel %vm884_vm9, %v877_v31, %v881_v32  ;;  %v887_v34 = vsel %vm884_vm9, %v881_v32, %v877_v31  ;;  %1024 = vmatpush2.msra.mxu0 %v904_v29 }
 0x10f   : > { %v902_v35 = vmul.f32 %v895_v23, %v885_v33  ;;  %v903_v36 = vmul.f32 %v899_v24, %v887_v34  ;;  %v1199_v24 = vrot.slane %v1194_v14, %v3064_v21  ;;  %v3269_v33 = vrot.slane %v1158_v26, %v3064_v21 }
 0x110   : > { %v3272_v34 = vrot.slane %v1158_v26, %v3066_v22 }
 0x111   : > { %1025 = vmatprep.subr.mxu0 %v903_v36 }
 0x112   : > { %1026 = vmatpush2.msra.mxu0 %v902_v35  ;;  %v1126_v35 = vld [vmem:[#allocation4 + $0x2] ss:$8 sm:$0x3] }
 0x113   : > { %1028 = vmatmul.mubr.f32.vlgmr.msra.gmra.mxu0 %v627_v37 }
 0x114   : > { %2288 = vmatprep.mubr.msk.f32.mxu0 %vm956_vm1, %v630_v38 }
 0x117   : > { %1034 = vmatmul.mubr.f32.gmra.mxu0 %v629_v39 }
 0x11a   : > { %v949_v40 = vpop.permute.xlu1 %948  ;;  %v954_v44 = vpop.permute.xlu0 %953 }
 0x1d3   : > { %v1029_v41 = vpop.f32.mrf.mxu0 }
 0x1d4   : > { %v1030_v42 = vadd.f32 %v1029_v41, %v949_v40 }
 0x1d5   : > { %v1031_v43 = vpop.f32.mrf.mxu0 }
 0x1d6   : > { %v3164_v45 = vmax.f32 %v1030_v42, 0.0  ;;  %v1032_v46 = vadd.f32 %v1031_v43, %v949_v40  ;;  %v3285_v42 = vrot.slane %v1126_v35, %v3064_v21  ;;  %v3288_v43 = vrot.slane %v1126_v35, %v3066_v22 }
 0x1d7   : > { %v1035_v47 = vpop.f32.mrf.mxu0 }
 0x1d8   : > { %v3166_v48 = vmax.f32 %v1032_v46, 0.0  ;;  %1246 = vrot.lane.b32.xlu1 %v3164_v45, %s2699_s20  ;;  %v1036_v49 = vadd.f32 %v1035_v47, %v954_v44 }
 0x1d9   : > { %v1037_v50 = vpop.f32.mrf.mxu0 }
 0x1da   : > { %1250 = vrot.lane.b32.xlu0 %v3166_v48, %s2699_s20  ;;  %v3172_v51 = vmax.f32 %v1036_v49, 0.0  ;;  %v1038_v52 = vadd.f32 %v1037_v50, %v954_v44  ;;  %v1094_v44 = vld [vmem:[#allocation4 + $0x1] ss:$8 sm:$0x3] }
 0x1dc   : > { %1214 = vrot.lane.b32.xlu1 %v3164_v45, %s2700_s24  ;;  %v3176_v53 = vmax.f32 %v1038_v52, 0.0 }
 0x1de   : > { %1218 = vrot.lane.b32.xlu0 %v3166_v48, %s2700_s24 }
 0x1e0   : > { %1182 = vrot.lane.b32.xlu1 %v3164_v45, %s2701_s11 }
 0x1e2   : > { %1186 = vrot.lane.b32.xlu0 %v3166_v48, %s2701_s11 }
 0x1e4   : > { %1146 = vrot.lane.b32.xlu1 %v3164_v45, %s2702_s7 }
 0x1e6   : > { %1150 = vrot.lane.b32.xlu0 %v3166_v48, %s2702_s7 }
 0x1e8   : > { %1114 = vrot.lane.b32.xlu1 %v3164_v45, %s2703_s5 }
 0x1ea   : > { %1118 = vrot.lane.b32.xlu0 %v3166_v48, %s2703_s5 }
 0x1ec   : > { %1082 = vrot.lane.b32.xlu1 %v3164_v45, %s2704_s8 }
 0x1ee   : > { %1086 = vrot.lane.b32.xlu0 %v3166_v48, %s2704_s8 }
 0x1f0   : > { %1248 = vrot.lane.b32.xlu1 %v3172_v51, %s2699_s20 }
 0x1f2   : > { %1252 = vrot.lane.b32.xlu0 %v3176_v53, %s2699_s20  ;;  %s605_s20 = scalar_lea.vmem %s3706_s16, %s3052_s12  ;;  %s2715_s16 = smov (!%p2297_p12), 16  }
 0x1f4   : > { %1216 = vrot.lane.b32.xlu1 %v3172_v51, %s2700_s24 }
 0x1f6   : > { %1220 = vrot.lane.b32.xlu0 %v3176_v53, %s2700_s24 }
 0x1f8   : > { %1184 = vrot.lane.b32.xlu1 %v3172_v51, %s2701_s11 }
 0x1fa   : > { %1188 = vrot.lane.b32.xlu0 %v3176_v53, %s2701_s11  ;;  %s3704_s11 = sld [smem:[#allocation20_spill]] }
 0x1fc   : > { %1050 = vrot.lane.b32.xlu1 %v3164_v45, %s2705_s21 }
 0x1fe   : > { %1054 = vrot.lane.b32.xlu0 %v3166_v48, %s2705_s21 }
 0x200   : > { %1148 = vrot.lane.b32.xlu1 %v3172_v51, %s2702_s7 }
 0x202   : > { %1152 = vrot.lane.b32.xlu0 %v3176_v53, %s2702_s7  ;;  %s592_s7 = scalar_lea.vmem %s3704_s11, %s3052_s12  ;;  %s3707_s11 = sld [smem:[#allocation22_spill]] }
 0x203   : > { %v1049_v55 = vld [vmem:[%s592_s7 + $0x8] sm:$0xff]  ;;  %v1048_v56 = vld [vmem:[%s592_s7] sm:$0xff] }
 0x204   : > { %1116 = vrot.lane.b32.xlu1 %v3172_v51, %s2703_s5 }
 0x206   : > { %1120 = vrot.lane.b32.xlu0 %v3176_v53, %s2703_s5 }
 0x208   : > { %1084 = vrot.lane.b32.xlu1 %v3172_v51, %s2704_s8 }
 0x20a   : > { %1088 = vrot.lane.b32.xlu0 %v3176_v53, %s2704_s8 }
 0x20c   : > { %1052 = vrot.lane.b32.xlu1 %v3172_v51, %s2705_s21 }
 0x20e   : > { %1056 = vrot.lane.b32.xlu0 %v3176_v53, %s2705_s21  ;;  %s2718_s21 = smov (!%p2297_p12), 111  }
 0x210   : > { %1280 = vrot.lane.b32.xlu1 %v3172_v51, %s2706_s14 }
 0x212   : > { %1284 = vrot.lane.b32.xlu0 %v3176_v53, %s2706_s14 }
 0x214   : > { %1278 = vrot.lane.b32.xlu1 %v3164_v45, %s2706_s14 }
 0x216   : > { %1282 = vrot.lane.b32.xlu0 %v3166_v48, %s2706_s14 }
 0x218   : > { %1353 = vperm.xlu1 %2504, %v1049_v55   ;;  %v3301_v55 = vrot.slane %v1094_v44, %v3064_v21 }
 0x21a   : > { %1348 = vperm.xlu0 %2503, %v1048_v56   ;;  %v3304_v56 = vrot.slane %v1094_v44, %v3066_v22 }
 0x24a   : > { %v1247_v58 = vpop.permute.xlu1 %1246 }
 0x24c   : > { %v1251_v62 = vpop.permute.xlu0 %1250 }
 0x24d   : > { %v1254_v63 = vsel %vm850_vm2, %v1247_v58, %v1251_v62  ;;  %v1256_v0 = vsel %vm850_vm2, %v1251_v62, %v1247_v58 }
 0x24e   : > { %v1270_v1 = vmul.f32 %v1263_v59, %v1254_v63  ;;  %v1271_v3 = vmul.f32 %v1267_v60, %v1256_v0  ;;  %v1215_v6 = vpop.permute.xlu1 %1214 }
 0x250   : > { %v1219_v15 = vpop.permute.xlu0 %1218 }
 0x251   : > { %v1222_v16 = vsel %vm816_vm3, %v1215_v6, %v1219_v15  ;;  %v1224_v17 = vsel %vm816_vm3, %v1219_v15, %v1215_v6 }
 0x252   : > { %v3254_v18 = vmul.f32 %v1231_v8, %v1222_v16  ;;  %v3256_v19 = vmul.f32 %v1235_v11, %v1224_v17  ;;  %v1183_v23 = vpop.permute.xlu1 %1182 }
 0x254   : > { %v1187_v27 = vpop.permute.xlu0 %1186 }
 0x255   : > { %v1190_v28 = vsel %vm782_vm4, %v1183_v23, %v1187_v27  ;;  %v1192_v29 = vsel %vm782_vm4, %v1187_v27, %v1183_v23 }
 0x256   : > { %v3264_v30 = vmul.f32 %v1199_v24, %v1190_v28  ;;  %v3266_v31 = vmul.f32 %v1203_v25, %v1192_v29  ;;  %v1147_v32 = vpop.permute.xlu1 %1146 }
 0x258   : > { %v1151_v36 = vpop.permute.xlu0 %1150 }
 0x259   : > { %v1154_v37 = vsel %vm744_vm5, %v1147_v32, %v1151_v36  ;;  %v1156_v38 = vsel %vm744_vm5, %v1151_v36, %v1147_v32  ;;  %v1062_v36 = vld [vmem:[#allocation4] ss:$8 sm:$0x3] }
 0x25a   : > { %v3279_v39 = vmul.f32 %v3269_v33, %v1156_v38  ;;  %v3282_v40 = vmul.f32 %v3272_v34, %v1154_v37  ;;  %v1115_v41 = vpop.permute.xlu1 %1114 }
 0x25c   : > { %v1119_v46 = vpop.permute.xlu0 %1118 }
 0x25d   : > { %v1122_v47 = vsel %vm710_vm6, %v1115_v41, %v1119_v46  ;;  %v1124_v49 = vsel %vm710_vm6, %v1119_v46, %v1115_v41  ;;  %v1067_v46 = vrot.slane %v1062_v36, %v3064_v21 }
 0x25e   : > { %v3295_v50 = vmul.f32 %v3285_v42, %v1124_v49  ;;  %v3298_v52 = vmul.f32 %v3288_v43, %v1122_v47  ;;  %v1083_v54 = vpop.permute.xlu1 %1082 }
 0x260   : > { %v1087_v57 = vpop.permute.xlu0 %1086 }
 0x261   : > { %v1090_v58 = vsel %vm676_vm7, %v1083_v54, %v1087_v57  ;;  %v1092_v61 = vsel %vm676_vm7, %v1087_v57, %v1083_v54 }
 0x262   : > { %v3311_v62 = vmul.f32 %v3301_v55, %v1092_v61  ;;  %v3314_v63 = vmul.f32 %v3304_v56, %v1090_v58  ;;  %v1249_v0 = vpop.permute.xlu1 %1248 }
 0x264   : > { %v1253_v6 = vpop.permute.xlu0 %1252 }
 0x265   : > { %v1255_v14 = vsel %vm850_vm2, %v1249_v0, %v1253_v6  ;;  %v1257_v15 = vsel %vm850_vm2, %v1253_v6, %v1249_v0 }
 0x266   : > { %v1272_v16 = vmul.f32 %v1263_v59, %v1255_v14  ;;  %v1273_v17 = vmul.f32 %v1267_v60, %v1257_v15  ;;  %v1217_v23 = vpop.permute.xlu1 %1216 }
 0x268   : > { %v1221_v26 = vpop.permute.xlu0 %1220  ;;  %1362 = vmatprep.subr.mxu1 %v1273_v17 }
 0x269   : > { %v1223_v27 = vsel %vm816_vm3, %v1217_v23, %v1221_v26  ;;  %v1225_v28 = vsel %vm816_vm3, %v1221_v26, %v1217_v23  ;;  %1363 = vmatpush1.msra.mxu1 %v1272_v16 }
 0x26a   : > { %v1240_v29 = vmul.f32 %v1231_v8, %v1223_v27  ;;  %v1241_v32 = vmul.f32 %v1235_v11, %v1225_v28  ;;  %v1185_v35 = vpop.permute.xlu1 %1184  ;;  %1364 = vmatprep.subr.mxu1 %v1271_v3  ;;  %v1071_v8 = vrot.slane %v1062_v36, %v3066_v22  ;;  %v1044_v36 = vld [vmem:[%s2930_s15] sm:$0xff] }
 0x26b   : > { %1365 = vmatpush1.msra.mxu1 %v1270_v1 }
 0x26c   : > { %v1189_v37 = vpop.permute.xlu0 %1188  ;;  %1366 = vmatprep.subr.mxu1 %v1241_v32 }
 0x26d   : > { %v1191_v59 = vsel %vm782_vm4, %v1185_v35, %v1189_v37  ;;  %v1193_v60 = vsel %vm782_vm4, %v1189_v37, %v1185_v35  ;;  %1367 = vmatpush1.msra.mxu1 %v1240_v29  ;;  %v1047_v37 = vld [vmem:[%s2930_s15 + $0x18] sm:$0xff] }
 0x26e   : > { %v1208_v38 = vmul.f32 %v1199_v24, %v1191_v59  ;;  %v1209_v41 = vmul.f32 %v1203_v25, %v1193_v60  ;;  %v1051_v44 = vpop.permute.xlu1 %1050  ;;  %1368 = vmatprep.subr.mxu1 %v3256_v19  ;;  %v1046_v59 = vld [vmem:[%s2930_s15 + $0x10] sm:$0xff]  ;;  %s2281_s15 = sshll.u32 %s3029_s9, 2 }
 0x26f   : > { %1369 = vmatpush1.msra.mxu1 %v3254_v18  ;;  %s596_s14 = scalar_lea.vmem %s3705_s17, %s2281_s15  ;;  %s600_s7 = scalar_lea.vmem %s3707_s11, %s2281_s15 }
 0x270   : > { %v1055_v1 = vpop.permute.xlu0 %1054  ;;  %1370 = vmatprep.subr.mxu1 %v1209_v41  ;;  %s3708_s17 = sld [smem:[#allocation24_spill]]  ;;  %s2710_s15 = smov (!%p2297_p12), 112  }
 0x271   : > { %v1058_v3 = vsel %vm643_vm8, %v1051_v44, %v1055_v1  ;;  %v1060_v11 = vsel %vm643_vm8, %v1055_v1, %v1051_v44  ;;  %1371 = vmatpush1.msra.mxu1 %v1208_v38  ;;  %s3709_s11 = sld [smem:[#allocation25_spill]] (!%p2297_p12) }
 0x272   : > { %v1074_v24 = vmul.f32 %v1067_v46, %v1060_v11  ;;  %v1075_v25 = vmul.f32 %v1071_v8, %v1058_v3  ;;  %v1149_v47 = vpop.permute.xlu1 %1148  ;;  %1372 = vmatprep.subr.mxu1 %v3266_v31 }
 0x273   : > { %1373 = vmatpush1.msra.mxu1 %v3264_v30 }
 0x274   : > { %v1153_v49 = vpop.permute.xlu0 %1152  ;;  %1374 = vmatprep.subr.mxu1 %v3176_v53 }
 0x275   : > { %v1155_v18 = vsel %vm744_vm5, %v1149_v47, %v1153_v49  ;;  %v1157_v19 = vsel %vm744_vm5, %v1153_v49, %v1149_v47  ;;  %1375 = vmatpush1.msra.mxu1 %v3172_v51  ;;  %v2708_v49 = vmov 0.0  }
 0x276   : > { %v1172_v54 = vmul.f32 %v3269_v33, %v1157_v19  ;;  %v1173_v57 = vmul.f32 %v3272_v34, %v1155_v18  ;;  %v1117_v58 = vpop.permute.xlu1 %1116  ;;  %1376 = vmatprep.subr.mxu1 %v3166_v48  ;;  %2319 = vmatprep.subr.mxu0 %v2708_v49 }
 0x277   : > { %1377 = vmatpush1.msra.mxu1 %v3164_v45  ;;  %2323 = vmatprep.mubr.msk.f32.mxu0 %vm2709_vm10, %v2708_v49 }
 0x278   : > { %v1121_v30 = vpop.permute.xlu0 %1120  ;;  %1378 = vmatprep.subr.mxu1 %v1173_v57 }
 0x279   : > { %v1123_v53 = vsel %vm710_vm6, %v1117_v58, %v1121_v30  ;;  %v1125_v31 = vsel %vm710_vm6, %v1121_v30, %v1117_v58  ;;  %1379 = vmatpush1.msra.mxu1 %v1172_v54  ;;  %v1448_v58 = vld [vmem:[%s596_s14] sm:$0xf]  ;;  %s610_s14 = scalar_lea.vmem %s3708_s17, %s3052_s12  ;;  %s3425_s12 = scalar_lea.vmem [#allocation9], %s2981_s13 }
 0x27a   : > { %v1140_v51 = vmul.f32 %v3285_v42, %v1125_v31  ;;  %v1141_v33 = vmul.f32 %v3288_v43, %v1123_v53  ;;  %v1085_v61 = vpop.permute.xlu1 %1084  ;;  %1380 = vmatprep.subr.mxu1 %v3282_v40  ;;  %v1290_v43 = vld [vmem:[#allocation4 + $0x7] ss:$8 sm:$0x3]  ;;  %v1449_v53 = vld [vmem:[%s600_s7] sm:$0xf]  ;;  %s2713_s13 = smov (!%p2297_p12), 1  }
 0x27b   : > { %1381 = vmatpush1.msra.mxu1 %v3279_v39  ;;  %v1299_v17 = vrot.slane %v1290_v43, %v3066_v22  ;;  %v1524_v30 = vld [vmem:[%s605_s20] sm:$0xff] }
 0x27c   : > { %v1089_v48 = vpop.permute.xlu0 %1088  ;;  %1382 = vmatprep.subr.mxu1 %v1141_v33 }
 0x27d   : > { %v1091_v45 = vsel %vm676_vm7, %v1085_v61, %v1089_v48  ;;  %v1093_v34 = vsel %vm676_vm7, %v1089_v48, %v1085_v61  ;;  %1383 = vmatpush1.msra.mxu1 %v1140_v51  ;;  %v1525_v48 = vld [vmem:[%s605_s20 + $0x8] sm:$0xff]  ;;  %s2716_s20 = smov (!%p2297_p12), 17  }
 0x27e   : > { %v1108_v0 = vmul.f32 %v3301_v55, %v1093_v34  ;;  %v1109_v42 = vmul.f32 %v3304_v56, %v1091_v45  ;;  %v1053_v6 = vpop.permute.xlu1 %1052  ;;  %1384 = vmatprep.subr.mxu1 %v3298_v52  ;;  %v1295_v56 = vrot.slane %v1290_v43, %v3064_v21  ;;  %v1527_v45 = vld [vmem:[%s610_s14 + $0x8] sm:$0xff] }
 0x27f   : > { %1385 = vmatpush1.msra.mxu1 %v3295_v50 }
 0x280   : > { %v1057_v39 = vpop.permute.xlu0 %1056  ;;  %1386 = vmatprep.subr.mxu1 %v1109_v42 }
 0x281   : > { %v1059_v40 = vsel %vm643_vm8, %v1053_v6, %v1057_v39  ;;  %v1061_v14 = vsel %vm643_vm8, %v1057_v39, %v1053_v6  ;;  %1387 = vmatpush1.msra.mxu1 %v1108_v0  ;;  %v1526_v0 = vld [vmem:[%s610_s14] sm:$0xff] }
 0x282   : > { %v1076_v15 = vmul.f32 %v1067_v46, %v1061_v14  ;;  %v1077_v16 = vmul.f32 %v1071_v8, %v1059_v40  ;;  %v1281_v55 = vpop.permute.xlu1 %1280  ;;  %1388 = vmatprep.subr.mxu1 %v3314_v63 }
 0x283   : > { %1389 = vmatpush1.msra.mxu1 %v3311_v62 }
 0x284   : > { %v1285_v50 = vpop.permute.xlu0 %1284  ;;  %1390 = vmatprep.subr.mxu1 %v1077_v16 }
 0x285   : > { %v1287_v52 = vsel %vm884_vm9, %v1281_v55, %v1285_v50  ;;  %v1289_v23 = vsel %vm884_vm9, %v1285_v50, %v1281_v55  ;;  %1391 = vmatpush1.msra.mxu1 %v1076_v15 }
 0x286   : > { %v1304_v26 = vmul.f32 %v1295_v56, %v1287_v52  ;;  %v1305_v27 = vmul.f32 %v1299_v17, %v1289_v23  ;;  %1392 = vmatprep.subr.mxu1 %v1075_v25  ;;  %v1279_v28 = vpop.permute.xlu1 %1278 }
 0x287   : > { %1393 = vmatpush1.msra.mxu1 %v1074_v24 }
 0x288   : > { %v1283_v63 = vpop.permute.xlu0 %1282  ;;  %1422 = vmatprep.subr.mxu1 %v1305_v27 }
 0x289   : > { %v1286_v62 = vsel %vm884_vm9, %v1279_v28, %v1283_v63  ;;  %v1288_v29 = vsel %vm884_vm9, %v1283_v63, %v1279_v28  ;;  %1423 = vmatpush2.msra.mxu1 %v1304_v26 }
 0x28a   : > { %v1302_v32 = vmul.f32 %v1295_v56, %v1286_v62  ;;  %v1303_v35 = vmul.f32 %v1299_v17, %v1288_v29 }
 0x28c   : > { %1424 = vmatprep.subr.mxu1 %v1303_v35 }
 0x28d   : > { %1425 = vmatpush2.msra.mxu1 %v1302_v32 }
 0x28e   : > { %1427 = vmatmul.mubr.f32.vlgmr.msra.gmra.mxu1 %v1044_v36 }
 0x28f   : > { %2290 = vmatprep.mubr.msk.f32.mxu1 %vm956_vm1, %v1047_v37 }
 0x292   : > { %1433 = vmatmul.mubr.f32.gmra.mxu1 %v1046_v59 }
 0x293   : > { %v1354_v3 = vpop.permute.xlu1 %1353  ;;  %2328 = vmatprep.mubr.msk.f32.mxu1 %vm1528_vm11, %v1524_v30 }
 0x295   : > { %v1349_v38 = vpop.permute.xlu0 %1348 }
 0x34e   : > { %v1428_v60 = vpop.f32.mrf.mxu1 }
 0x34f   : > { %v3384_v44 = vadd.f32 %v1428_v60, %v1349_v38 }
 0x350   : > { %v1430_v41 = vpop.f32.mrf.mxu1 }
 0x351   : > { %v3386_v46 = vadd.f32 %v1430_v41, %v1349_v38 }
 0x352   : > { %v1434_v8 = vpop.f32.mrf.mxu1 }
 0x353   : > { %v1439_v1 = vadd.f32 %v3386_v46, %v3384_v44  ;;  %v1435_v24 = vadd.f32 %v1434_v8, %v1354_v3 }
 0x354   : > { %v1436_v11 = vpop.f32.mrf.mxu1 }
 0x355   : > { %v1437_v25 = vadd.f32 %v1436_v11, %v1354_v3  ;;  %1440 = vadd.xlane.f32.xlu0 %v1439_v1 }
 0x357   : > { %v1442_v47 = vadd.f32 %v1437_v25, %v1435_v24 }
 0x359   : > { %1443 = vadd.xlane.f32.xlu1 %v1442_v47 }
 0x3de   : > { %v1441_v18 = vpop.xlane.xlu0 %1440 }
 0x3df   : > { %v1446_v57 = vmul.f32 0.00390625, %v1441_v18 }
 0x3e2   : > { %v1444_v19 = vpop.xlane.xlu1 %1443 }
 0x3e3   : > { %v1447_v54 = vmul.f32 0.00390625, %v1444_v19 }
 0x3e5   : > { %2320 = vmatpush3.msra.mxu0 %v1447_v54 }
 0x3e6   : > { %2321 = vmatprep.subr.mxu0 %v2708_v49 }
 0x3e7   : > { %2322 = vmatpush3.msra.mxu0 %v1446_v57 }
 0x3e8   : > { %2324 = vmatmul.mubr.msk.f32.vlgmr.msra.gmra.mxu0 %vm956_vm1, %v1448_v58 }
 0x4a8   : > { %v1519_v31 = vpop.f32.mrf.mxu0 }
 0x4a9   : > { %v1520_v51 = vadd.f32 %v1519_v31, %v1449_v53 }
 0x4aa   : > { %v2325_v33 = vpop.f32.mrf.mxu0 }
 0x4ab   : > { %v1523_v61 = vmax.f32 %v1520_v51, 0.0 }
 0x4ad   : > { %2326 = vmatprep.subr.msk.mxu1 %vm1535_vm12, %v1523_v61 }
 0x4ae   : > { %2327 = vmatpush3.msk.msra.mxu1 %vm1535_vm12, %v1523_v61 }
 0x4af   : > { %2329 = vmatmul.mubr.msk.f32.vlgmr.msra.gmra.mxu1 %vm1528_vm11, %v1525_v48 }
 0x56f   : > { %v2330_v34 = vpop.f32.mrf.mxu1 }
 0x570   : > { %v1611_v42 = vadd.f32 %v2330_v34, %v1527_v45 }
 0x571   : > { %v1605_v6 = vpop.f32.mrf.mxu1 }
 0x572   : > { %v2296_v43 = vmul.f32 -1.442695, %v1611_v42  ;;  %v1606_v39 = vadd.f32 %v1605_v6, %v1526_v0 }
 0x574   : > { %2505 = vpow2.f32 %v2296_v43  ;;  %v2295_v40 = vmul.f32 -1.442695, %v1606_v39 }
 0x576   : > { %2507 = vpow2.f32 %v2295_v40 }
 0x581   : > { %v2506_v14 = vpop.eup %2505 }
 0x582   : > { %v1621_v15 = vadd.f32 1.0, %v2506_v14 }
 0x583   : > { %v2508_v16 = vpop.eup %2507 }
 0x584   : > { %2509 = vrcp.f32 %v1621_v15  ;;  %v1620_v55 = vadd.f32 1.0, %v2508_v16 }
 0x586   : > { %2511 = vrcp.f32 %v1620_v55 }
 0x591   : > { %v2510_v56 = vpop.eup %2509 }
 0x592   : > { %1633 = vperm.xlu1 %2504, %v2510_v56  }
 0x593   : > { %v2512_v17 = vpop.eup %2511 }
 0x594   : > { %1628 = vperm.xlu0 %2503, %v2512_v17  }
 0x60d   : > { %v1634_v50 = vpop.permute.xlu1 %1633 }
 0x60e   : > { %v1638_v52 = vmul.f32 %v1634_v50, %v1435_v24  ;;  %v1639_v23 = vmul.f32 %v1634_v50, %v1437_v25 }
 0x60f   : > { %v1629_v26 = vpop.permute.xlu0 %1628 }
 0x610   : > { %v3407_v27 = vadd.f32 %v1638_v52, %v2953_v5  ;;  %v3410_v28 = vadd.f32 %v1639_v23, %v2971_v12  ;;  %v1636_v63 = vmul.f32 %v1629_v26, %v3384_v44  ;;  %v1637_v62 = vmul.f32 %v1629_v26, %v3386_v46  ;;  %1651 = sbr.rel (%p2297_p12) target bundleno = 1937 (0x791), region = 80 }
 0x612   : > { %1646 = vst [vmem:[#allocation2 + $0x18] sm:$0xff] %v3407_v27  ;;  %1647 = vst [vmem:[#allocation2 + $0x8] sm:$0xff] %v3410_v28  ;;  %v3417_v29 = vadd.f32 %v1636_v63, %v2962_v9  ;;  %v3420_v32 = vadd.f32 %v1637_v62, %v2977_v13 }
 0x614   : > { %1644 = vst [vmem:[#allocation2 + $0x10] sm:$0xff] %v3417_v29  ;;  %1645 = vst [vmem:[#allocation2] sm:$0xff] %v3420_v32 }
 0x615   : > { %1854 = vrot.lane.b32.xlu1 %v3417_v29, %s2710_s15  ;;  %1856 = vrot.lane.b32.xlu0 %v3407_v27, %s2710_s15  ;;  %v1653_v5 = vld [vmem:[%s3709_s11 + $0x8] sm:$0xff]  ;;  %v1655_v9 = vld [vmem:[%s3709_s11 + $0x18] sm:$0xff]  ;;  %v2717_v12 = vmov 0  }
 0x616   : > { %2298 = vmatprep.mubr.msk.f32.mxu0 %vm956_vm1, %v1653_v5  ;;  %2299 = vmatprep.mubr.msk.f32.mxu1 %vm956_vm1, %v1655_v9  ;;  %v1866_v36 = vld [vmem:[#allocation4 + $0x6] ss:$8 sm:$0x3]  ;;  %v1834_v60 = vld [vmem:[#allocation4 + $0x5] ss:$8 sm:$0x3] }
 0x617   : > { %2514 = vset.pattern.permute.xlu1 %v2717_v12  ;;  %2513 = vset.pattern.permute.xlu0 %v2717_v12  ;;  %v1871_v38 = vrot.slane %v1866_v36, %v3064_v21  ;;  %v1875_v41 = vrot.slane %v1866_v36, %v3066_v22  ;;  %v1839_v8 = vrot.slane %v1834_v60, %v3064_v21  ;;  %v1802_v51 = vld [vmem:[#allocation4 + $0x4] ss:$8 sm:$0x3]  ;;  %v1766_v55 = vld [vmem:[#allocation4 + $0x3] ss:$8 sm:$0x3] }
 0x618   : > { %v1843_v1 = vrot.slane %v1834_v60, %v3066_v22  ;;  %v1807_v42 = vrot.slane %v1802_v51, %v3064_v21  ;;  %v1811_v6 = vrot.slane %v1802_v51, %v3066_v22  ;;  %v1771_v63 = vrot.slane %v1766_v55, %v3064_v21 }
 0x619   : > { %1858 = vrot.lane.b32.xlu1 %v3420_v32, %s2710_s15  ;;  %1860 = vrot.lane.b32.xlu0 %v3410_v28, %s2710_s15  ;;  %s3710_s15 = sld [smem:[#allocation26_spill]]  ;;  %v1775_v62 = vrot.slane %v1766_v55, %v3066_v22 }
 0x61d   : > { %1828 = vrot.lane.b32.xlu1 %v3410_v28, %s2711_s6  ;;  %1824 = vrot.lane.b32.xlu0 %v3407_v27, %s2711_s6 }
 0x61f   : > { %v1657_v13 = vld [vmem:[%s3710_s15 + $0x8] sm:$0xff]  ;;  %v1656_v35 = vld [vmem:[%s3710_s15] sm:$0xff] }
 0x621   : > { %1826 = vrot.lane.b32.xlu1 %v3420_v32, %s2711_s6  ;;  %1822 = vrot.lane.b32.xlu0 %v3417_v29, %s2711_s6 }
 0x625   : > { %1796 = vrot.lane.b32.xlu1 %v3410_v28, %s2712_s27  ;;  %1792 = vrot.lane.b32.xlu0 %v3407_v27, %s2712_s27 }
 0x629   : > { %1794 = vrot.lane.b32.xlu1 %v3420_v32, %s2712_s27  ;;  %1790 = vrot.lane.b32.xlu0 %v3417_v29, %s2712_s27 }
 0x62d   : > { %1760 = vrot.lane.b32.xlu1 %v3410_v28, %s2713_s13  ;;  %1756 = vrot.lane.b32.xlu0 %v3407_v27, %s2713_s13 }
 0x631   : > { %1758 = vrot.lane.b32.xlu1 %v3420_v32, %s2713_s13  ;;  %1754 = vrot.lane.b32.xlu0 %v3417_v29, %s2713_s13 }
 0x635   : > { %1728 = vrot.lane.b32.xlu1 %v3410_v28, %s2714_s10  ;;  %1724 = vrot.lane.b32.xlu0 %v3407_v27, %s2714_s10 }
 0x639   : > { %1726 = vrot.lane.b32.xlu1 %v3420_v32, %s2714_s10  ;;  %1722 = vrot.lane.b32.xlu0 %v3417_v29, %s2714_s10 }
 0x63d   : > { %1696 = vrot.lane.b32.xlu1 %v3410_v28, %s2715_s16  ;;  %1692 = vrot.lane.b32.xlu0 %v3407_v27, %s2715_s16 }
 0x641   : > { %1694 = vrot.lane.b32.xlu1 %v3420_v32, %s2715_s16  ;;  %1690 = vrot.lane.b32.xlu0 %v3417_v29, %s2715_s16 }
 0x645   : > { %1664 = vrot.lane.b32.xlu1 %v3410_v28, %s2716_s20  ;;  %1660 = vrot.lane.b32.xlu0 %v3407_v27, %s2716_s20 }
 0x649   : > { %1662 = vrot.lane.b32.xlu1 %v3420_v32, %s2716_s20  ;;  %1658 = vrot.lane.b32.xlu0 %v3417_v29, %s2716_s20 }
 0x64d   : > { %1892 = vrot.lane.b32.xlu1 %v3410_v28, %s2718_s21  ;;  %1888 = vrot.lane.b32.xlu0 %v3407_v27, %s2718_s21 }
 0x651   : > { %1890 = vrot.lane.b32.xlu1 %v3420_v32, %s2718_s21  ;;  %1886 = vrot.lane.b32.xlu0 %v3417_v29, %s2718_s21 }
 0x655   : > { %1961 = vperm.xlu1 %2514, %v1657_v13   ;;  %1956 = vperm.xlu0 %2513, %v1656_v35  }
 0x687   : > { %v1855_v37 = vpop.permute.xlu1 %1854  ;;  %v1857_v59 = vpop.permute.xlu0 %1856 }
 0x68b   : > { %v1859_v44 = vpop.permute.xlu1 %1858  ;;  %v1861_v46 = vpop.permute.xlu0 %1860 }
 0x68c   : > { %v1862_v3 = vsel %vm850_vm2, %v1855_v37, %v1859_v44  ;;  %v1864_v11 = vsel %vm850_vm2, %v1859_v44, %v1855_v37  ;;  %v1863_v24 = vsel %vm850_vm2, %v1857_v59, %v1861_v46  ;;  %v1865_v25 = vsel %vm850_vm2, %v1861_v46, %v1857_v59  ;;  %v1734_v37 = vld [vmem:[#allocation4 + $0x2] ss:$8 sm:$0x3] }
 0x68d   : > { %v1878_v47 = vmul.f32 %v1871_v38, %v1862_v3  ;;  %v1879_v49 = vmul.f32 %v1875_v41, %v1864_v11  ;;  %v1880_v18 = vmul.f32 %v1871_v38, %v1863_v24  ;;  %v1881_v19 = vmul.f32 %v1875_v41, %v1865_v25  ;;  %v1702_v24 = vld [vmem:[#allocation4 + $0x1] ss:$8 sm:$0x3] }
 0x68e   : > { %v1739_v44 = vrot.slane %v1734_v37, %v3064_v21  ;;  %v1743_v46 = vrot.slane %v1734_v37, %v3066_v22 }
 0x68f   : > { %v1829_v54 = vpop.permute.xlu1 %1828  ;;  %v1825_v57 = vpop.permute.xlu0 %1824  ;;  %1970 = vmatprep.subr.mxu0 %v1881_v19  ;;  %2331 = vmatprep.subr.mxu1 %v1881_v19 }
 0x690   : > { %v1831_v58 = vsel %vm816_vm3, %v1825_v57, %v1829_v54  ;;  %v1833_v30 = vsel %vm816_vm3, %v1829_v54, %v1825_v57  ;;  %1971 = vmatpush1.msra.mxu0 %v1880_v18  ;;  %2349 = vmatpush1.msra.mxu1 %v1880_v18  ;;  %v1707_v57 = vrot.slane %v1702_v24, %v3064_v21 }
 0x691   : > { %v1848_v53 = vmul.f32 %v1839_v8, %v1831_v58  ;;  %v1849_v31 = vmul.f32 %v1843_v1, %v1833_v30  ;;  %1972 = vmatprep.subr.mxu0 %v1879_v49  ;;  %2332 = vmatprep.subr.mxu1 %v1879_v49  ;;  %v1711_v58 = vrot.slane %v1702_v24, %v3066_v22 }
 0x692   : > { %1973 = vmatpush1.msra.mxu0 %v1878_v47  ;;  %2350 = vmatpush1.msra.mxu1 %v1878_v47 }
 0x693   : > { %v1827_v33 = vpop.permute.xlu1 %1826  ;;  %v1823_v61 = vpop.permute.xlu0 %1822  ;;  %1974 = vmatprep.subr.mxu0 %v1849_v31  ;;  %2333 = vmatprep.subr.mxu1 %v1849_v31 }
 0x694   : > { %v1830_v48 = vsel %vm816_vm3, %v1823_v61, %v1827_v33  ;;  %v1832_v45 = vsel %vm816_vm3, %v1827_v33, %v1823_v61  ;;  %1975 = vmatpush1.msra.mxu0 %v1848_v53  ;;  %2351 = vmatpush1.msra.mxu1 %v1848_v53 }
 0x695   : > { %v1846_v34 = vmul.f32 %v1839_v8, %v1830_v48  ;;  %v1847_v0 = vmul.f32 %v1843_v1, %v1832_v45  ;;  %v1670_v48 = vld [vmem:[#allocation4] ss:$8 sm:$0x3] }
 0x697   : > { %v1797_v43 = vpop.permute.xlu1 %1796  ;;  %v1793_v39 = vpop.permute.xlu0 %1792  ;;  %1976 = vmatprep.subr.mxu0 %v1847_v0  ;;  %2334 = vmatprep.subr.mxu1 %v1847_v0 }
 0x698   : > { %v1799_v40 = vsel %vm782_vm4, %v1793_v39, %v1797_v43  ;;  %v1801_v14 = vsel %vm782_vm4, %v1797_v43, %v1793_v39  ;;  %1977 = vmatpush1.msra.mxu0 %v1846_v34  ;;  %2352 = vmatpush1.msra.mxu1 %v1846_v34  ;;  %v1675_v39 = vrot.slane %v1670_v48, %v3064_v21 }
 0x699   : > { %v1816_v15 = vmul.f32 %v1807_v42, %v1799_v40  ;;  %v1817_v16 = vmul.f32 %v1811_v6, %v1801_v14  ;;  %v1679_v40 = vrot.slane %v1670_v48, %v3066_v22 }
 0x69b   : > { %v1795_v56 = vpop.permute.xlu1 %1794  ;;  %v1791_v17 = vpop.permute.xlu0 %1790  ;;  %1978 = vmatprep.subr.mxu0 %v1817_v16  ;;  %2335 = vmatprep.subr.mxu1 %v1817_v16 }
 0x69c   : > { %v1798_v50 = vsel %vm782_vm4, %v1791_v17, %v1795_v56  ;;  %v1800_v52 = vsel %vm782_vm4, %v1795_v56, %v1791_v17  ;;  %1979 = vmatpush1.msra.mxu0 %v1816_v15  ;;  %2353 = vmatpush1.msra.mxu1 %v1816_v15 }
 0x69d   : > { %v1814_v23 = vmul.f32 %v1807_v42, %v1798_v50  ;;  %v1815_v26 = vmul.f32 %v1811_v6, %v1800_v52  ;;  %v1898_v50 = vld [vmem:[#allocation4 + $0x7] ss:$8 sm:$0x3] }
 0x69f   : > { %v1761_v5 = vpop.permute.xlu1 %1760  ;;  %v1757_v9 = vpop.permute.xlu0 %1756  ;;  %1980 = vmatprep.subr.mxu0 %v1815_v26  ;;  %2336 = vmatprep.subr.mxu1 %v1815_v26 }
 0x6a0   : > { %v1763_v12 = vsel %vm744_vm5, %v1757_v9, %v1761_v5  ;;  %v1765_v13 = vsel %vm744_vm5, %v1761_v5, %v1757_v9  ;;  %1981 = vmatpush1.msra.mxu0 %v1814_v23  ;;  %2354 = vmatpush1.msra.mxu1 %v1814_v23  ;;  %v1903_v9 = vrot.slane %v1898_v50, %v3064_v21 }
 0x6a1   : > { %v1780_v35 = vmul.f32 %v1771_v63, %v1765_v13  ;;  %v1781_v36 = vmul.f32 %v1775_v62, %v1763_v12  ;;  %1982 = vmatprep.subr.mxu0 %v3410_v28  ;;  %2337 = vmatprep.subr.mxu1 %v3410_v28  ;;  %v1907_v12 = vrot.slane %v1898_v50, %v3066_v22 }
 0x6a2   : > { %1983 = vmatpush1.msra.mxu0 %v3407_v27  ;;  %2355 = vmatpush1.msra.mxu1 %v3407_v27 }
 0x6a3   : > { %v1759_v59 = vpop.permute.xlu1 %1758  ;;  %v1755_v60 = vpop.permute.xlu0 %1754  ;;  %1984 = vmatprep.subr.mxu0 %v3420_v32  ;;  %2338 = vmatprep.subr.mxu1 %v3420_v32 }
 0x6a4   : > { %v1762_v38 = vsel %vm744_vm5, %v1755_v60, %v1759_v59  ;;  %v1764_v41 = vsel %vm744_vm5, %v1759_v59, %v1755_v60  ;;  %1985 = vmatpush1.msra.mxu0 %v3417_v29  ;;  %2356 = vmatpush1.msra.mxu1 %v3417_v29 }
 0x6a5   : > { %v1778_v28 = vmul.f32 %v1771_v63, %v1764_v41  ;;  %v1779_v27 = vmul.f32 %v1775_v62, %v1762_v38  ;;  %1986 = vmatprep.subr.mxu0 %v1781_v36  ;;  %2339 = vmatprep.subr.mxu1 %v1781_v36 }
 0x6a6   : > { %1987 = vmatpush1.msra.mxu0 %v1780_v35  ;;  %2357 = vmatpush1.msra.mxu1 %v1780_v35 }
 0x6a7   : > { %v1729_v32 = vpop.permute.xlu1 %1728  ;;  %v1725_v8 = vpop.permute.xlu0 %1724  ;;  %1988 = vmatprep.subr.mxu0 %v1779_v27  ;;  %2340 = vmatprep.subr.mxu1 %v1779_v27  ;;  %v1652_v27 = vld [vmem:[%s3709_s11] sm:$0xff] }
 0x6a8   : > { %v1731_v1 = vsel %vm710_vm6, %v1725_v8, %v1729_v32  ;;  %v1733_v3 = vsel %vm710_vm6, %v1729_v32, %v1725_v8  ;;  %1989 = vmatpush1.msra.mxu0 %v1778_v28  ;;  %2358 = vmatpush1.msra.mxu1 %v1778_v28 }
 0x6a9   : > { %v1748_v29 = vmul.f32 %v1739_v44, %v1733_v3  ;;  %v1749_v11 = vmul.f32 %v1743_v46, %v1731_v1 }
 0x6ab   : > { %v1727_v25 = vpop.permute.xlu1 %1726  ;;  %v1723_v47 = vpop.permute.xlu0 %1722  ;;  %1990 = vmatprep.subr.mxu0 %v1749_v11  ;;  %2341 = vmatprep.subr.mxu1 %v1749_v11 }
 0x6ac   : > { %v1730_v49 = vsel %vm710_vm6, %v1723_v47, %v1727_v25  ;;  %v1732_v18 = vsel %vm710_vm6, %v1727_v25, %v1723_v47  ;;  %1991 = vmatpush1.msra.mxu0 %v1748_v29  ;;  %2359 = vmatpush1.msra.mxu1 %v1748_v29 }
 0x6ad   : > { %v1746_v19 = vmul.f32 %v1739_v44, %v1732_v18  ;;  %v1747_v54 = vmul.f32 %v1743_v46, %v1730_v49  ;;  %v1654_v46 = vld [vmem:[%s3709_s11 + $0x10] sm:$0xff] }
 0x6af   : > { %v1697_v30 = vpop.permute.xlu1 %1696  ;;  %v1693_v53 = vpop.permute.xlu0 %1692  ;;  %1992 = vmatprep.subr.mxu0 %v1747_v54  ;;  %2342 = vmatprep.subr.mxu1 %v1747_v54 }
 0x6b0   : > { %v1699_v31 = vsel %vm676_vm7, %v1693_v53, %v1697_v30  ;;  %v1701_v51 = vsel %vm676_vm7, %v1697_v30, %v1693_v53  ;;  %1993 = vmatpush1.msra.mxu0 %v1746_v19  ;;  %2360 = vmatpush1.msra.mxu1 %v1746_v19 }
 0x6b1   : > { %v1716_v33 = vmul.f32 %v1707_v57, %v1701_v51  ;;  %v1717_v61 = vmul.f32 %v1711_v58, %v1699_v31 }
 0x6b3   : > { %v1695_v45 = vpop.permute.xlu1 %1694  ;;  %v1691_v34 = vpop.permute.xlu0 %1690  ;;  %1994 = vmatprep.subr.mxu0 %v1717_v61  ;;  %2343 = vmatprep.subr.mxu1 %v1717_v61 }
 0x6b4   : > { %v1698_v0 = vsel %vm676_vm7, %v1691_v34, %v1695_v45  ;;  %v1700_v42 = vsel %vm676_vm7, %v1695_v45, %v1691_v34  ;;  %1995 = vmatpush1.msra.mxu0 %v1716_v33  ;;  %2361 = vmatpush1.msra.mxu1 %v1716_v33 }
 0x6b5   : > { %v1714_v6 = vmul.f32 %v1707_v57, %v1700_v42  ;;  %v1715_v43 = vmul.f32 %v1711_v58, %v1698_v0 }
 0x6b7   : > { %v1665_v14 = vpop.permute.xlu1 %1664  ;;  %v1661_v15 = vpop.permute.xlu0 %1660  ;;  %1996 = vmatprep.subr.mxu0 %v1715_v43  ;;  %2344 = vmatprep.subr.mxu1 %v1715_v43 }
 0x6b8   : > { %v1667_v16 = vsel %vm643_vm8, %v1661_v15, %v1665_v14  ;;  %v1669_v55 = vsel %vm643_vm8, %v1665_v14, %v1661_v15  ;;  %1997 = vmatpush1.msra.mxu0 %v1714_v6  ;;  %2362 = vmatpush1.msra.mxu1 %v1714_v6 }
 0x6b9   : > { %v1684_v56 = vmul.f32 %v1675_v39, %v1669_v55  ;;  %v1685_v17 = vmul.f32 %v1679_v40, %v1667_v16 }
 0x6bb   : > { %v1663_v52 = vpop.permute.xlu1 %1662  ;;  %v1659_v23 = vpop.permute.xlu0 %1658  ;;  %1998 = vmatprep.subr.mxu0 %v1685_v17  ;;  %2345 = vmatprep.subr.mxu1 %v1685_v17 }
 0x6bc   : > { %v1666_v26 = vsel %vm643_vm8, %v1659_v23, %v1663_v52  ;;  %v1668_v63 = vsel %vm643_vm8, %v1663_v52, %v1659_v23  ;;  %1999 = vmatpush1.msra.mxu0 %v1684_v56  ;;  %2363 = vmatpush1.msra.mxu1 %v1684_v56 }
 0x6bd   : > { %v1682_v62 = vmul.f32 %v1675_v39, %v1668_v63  ;;  %v1683_v5 = vmul.f32 %v1679_v40, %v1666_v26 }
 0x6bf   : > { %v1893_v13 = vpop.permute.xlu1 %1892  ;;  %v1889_v35 = vpop.permute.xlu0 %1888  ;;  %2000 = vmatprep.subr.mxu0 %v1683_v5  ;;  %2346 = vmatprep.subr.mxu1 %v1683_v5 }
 0x6c0   : > { %v1895_v36 = vsel %vm884_vm9, %v1889_v35, %v1893_v13  ;;  %v1897_v37 = vsel %vm884_vm9, %v1893_v13, %v1889_v35  ;;  %2001 = vmatpush1.msra.mxu0 %v1682_v62  ;;  %2364 = vmatpush1.msra.mxu1 %v1682_v62 }
 0x6c1   : > { %v1912_v59 = vmul.f32 %v1903_v9, %v1895_v36  ;;  %v1913_v60 = vmul.f32 %v1907_v12, %v1897_v37 }
 0x6c3   : > { %v1891_v38 = vpop.permute.xlu1 %1890  ;;  %v1887_v41 = vpop.permute.xlu0 %1886  ;;  %2030 = vmatprep.subr.mxu0 %v1913_v60  ;;  %2347 = vmatprep.subr.mxu1 %v1913_v60 }
 0x6c4   : > { %v1894_v21 = vsel %vm884_vm9, %v1887_v41, %v1891_v38  ;;  %v1896_v22 = vsel %vm884_vm9, %v1891_v38, %v1887_v41  ;;  %2031 = vmatpush2.msra.mxu0 %v1912_v59  ;;  %2365 = vmatpush2.msra.mxu1 %v1912_v59 }
 0x6c5   : > { %v1910_v44 = vmul.f32 %v1903_v9, %v1894_v21  ;;  %v1911_v28 = vmul.f32 %v1907_v12, %v1896_v22 }
 0x6c7   : > { %2032 = vmatprep.subr.mxu0 %v1911_v28  ;;  %2348 = vmatprep.subr.mxu1 %v1911_v28 }
 0x6c8   : > { %2033 = vmatpush2.msra.mxu0 %v1910_v44  ;;  %2366 = vmatpush2.msra.mxu1 %v1910_v44 }
 0x6c9   : > { %2035 = vmatmul.mubr.f32.vlgmr.msra.gmra.mxu0 %v1652_v27  ;;  %2041 = vmatmul.mubr.f32.vlgmr.msra.gmra.mxu1 %v1654_v46 }
 0x6d0   : > { %v1962_v20 = vpop.permute.xlu1 %1961  ;;  %v1957_v32 = vpop.permute.xlu0 %1956 }
 0x789   : > { %v2036_v8 = vpop.f32.mrf.mxu0  ;;  %v2042_v1 = vpop.f32.mrf.mxu1 }
 0x78a   : > { %v2037_v3 = vadd.f32 %v2036_v8, %v1957_v32  ;;  %v2043_v29 = vadd.f32 %v2042_v1, %v1962_v20 }
 0x78b   : > { %v2038_v11 = vpop.f32.mrf.mxu0  ;;  %v2044_v24 = vpop.f32.mrf.mxu1 }
 0x78c   : > { %v2047_v25 = vadd.f32 %v2037_v3, %v2948_v4  ;;  %v2049_v47 = vadd.f32 %v2043_v29, %v2946_v2  ;;  %v2039_v49 = vadd.f32 %v2038_v11, %v1957_v32  ;;  %v2045_v18 = vadd.f32 %v2044_v24, %v1962_v20 }
 0x78e   : > { %2051 = vst [vmem:[%s3425_s12] sm:$0xff] %v2047_v25  ;;  %2053 = vst [vmem:[%s3425_s12 + $0x10] sm:$0xff] %v2049_v47  ;;  %v2048_v19 = vadd.f32 %v2039_v49, %v2964_v10  ;;  %v2050_v54 = vadd.f32 %v2045_v18, %v2955_v7 }
 0x790   : > { %2052 = vst [vmem:[%s3425_s12 + $0x8] sm:$0xff] %v2048_v19  ;;  %2054 = vst [vmem:[%s3425_s12 + $0x18] sm:$0xff] %v2050_v54 }
 0x791 PF: > { %s3711_s9 = sld [smem:[#allocation15_spill]]  ;;  %s2312_s24 = sshll.u32 %s2681_s28, 9 }
 0x792   : > { %s3712_s21 = sld [smem:[#allocation27_spill]]  ;;  %s2069_s6 = sshll.u32 %s3425_s12, 4  ;;  %s3583_s6 = int_to_ptr.vmem [resolvable:$true] %s2069_s6 }
 0x793   : > { %s3587_s27 = scalar_lea.sflag [#allocation6], %s570_s18  ;;  %s2569_s13 = scalar_lea.vmem %s3583_s6, 512 }
 0x794   : > { %p2570_p0 = scmp.ne.s32.totalorder %s3583_s6, %s2569_s13  ;;  %s2719_s28 = smov [#allocation9]  }
 0x795   : > { %s2573_s10 = sshll.u32 %s2719_s28, 4  ;;  %s2574_s10 = int_to_ptr.vmem [resolvable:$false] %s2573_s10 }
 0x796   : > { %s2575_s16 = scalar_lea.vmem %s2574_s10, 1024  ;;  %p2576_p8 = scmp.lt.s32.totalorder %s3583_s6, %s2574_s10 }
 0x797   : > { %p3714_p1 = scmp.ne.s32.totalorder %s3711_s9, 0  ;;  %p2577_p9 = scmp.lt.s32.totalorder %s2575_s16, %s2569_s13 }
 0x798   : > { %s3713_s17 = smov %s3712_s21  ;;  %s3580_s14 = scalar_lea.hbm %s3712_s21, %s2312_s24 }
 0x799   : > { %p2571_p2 = pnand %p2570_p0, %p3714_p1  ;;  %p2578_p11 = por %p2577_p9, %p2576_p8 }
 0x79b   : > { %p2572_p5 = pneg %p2571_p2 }
 0x79d   : > { %p2579_p13 = pnand %p2578_p11, %p2572_p5 }
 0x79f   : > { %2582 = shalt.err (!%p2579_p13)
}
 0x7a0   : > { %s2583_s18 = scalar_lea.hbm %s3580_s14, 512  ;;  %s2587_s24 = scalar_lea.hbm %s3713_s17, 1024 }
 0x7a1   : > { %p2584_p4 = scmp.ne.s32.totalorder %s3580_s14, %s2583_s18  ;;  %p2588_p10 = scmp.lt.s32.totalorder %s3580_s14, %s3713_s17 }
 0x7a2   : > { %p2589_p3 = scmp.lt.s32.totalorder %s2587_s24, %s2583_s18 }
 0x7a3   : > { %p2585_p6 = pnand %p2584_p4, %p3714_p1 }
 0x7a4   : > { %p2590_p12 = por %p2589_p3, %p2588_p10 }
 0x7a5   : > { %p2586_p7 = pneg %p2585_p6 }
 0x7a7   : > { %p2591_p0 = pnand %p2590_p12, %p2586_p7 }
 0x7a9   : > { %2594 = shalt.err (!%p2591_p0)
}
 0x7aa   : > { %s2720_s21 = smov 256  }
 0x7ab   : > { %2373 = dma.vmem_to_hbm [thread:$0]  (%p3714_p1), %s3583_s6, 512, %s3580_s14, %s3587_s27, %s2720_s21, %s2720_s21, %s2704_s8  }
 0x7ac PF: > { %s3715_s13 = sld [smem:[#allocation14_spill]] }
 0x7ad   : > { %s3716_s28 = sld [smem:[#allocation13_spill]] }
 0x7ae   : > { %s3717_s10 = sld [smem:[#allocation16_spill]] }
 0x7b2   : > { %p2390_p2 = scmp.ge.s32.totalorder %s3715_s13, 2 }
 0x7b3   : > { %s2084_s16 = sand.u32 1, %s3716_s28  }
 0x7b4   : > { %p3718_p5 = scmp.ne.s32.totalorder %s3717_s10, 0  ;;  %s2085_s18 = scalar_lea.sflag [#allocation6], %s2084_s16 }
 0x7b6   : > { %p2384_p8 = pnand %p2390_p2, %p3718_p5 }
 0x7b8   : > { %p2385_p9 = pneg %p2384_p8 }
 0x7ba   : > { %2648 = dma.done.wait (%p2385_p9), %s2085_s18, 512  }
 0x7bb   : > { %2650 = vsyncadd (%p2385_p9), %s2085_s18, 4294966784  ;;  %s29_s13 = sadd.s32 1, %s3715_s13   ;;  %s3719_s8 = sld [smem:[#allocation17_spill]] }
 0x7bc   : > { %p26_p11 = scmp.ge.s32.totalorder %s29_s13, 6   ;;  %s3720_s9 = sld [smem:[#allocation18_spill]] }
 0x7bd   : > { %s3721_s21 = smov %s2657_s22  ;;  %s3722_s22 = smov %s2661_s23 }
 0x7be   : > { %s3723_s23 = smov %s2917_s19  ;;  %s3724_s24 = smov %s2669_s25 }
 0x7bf   : > { %s3725_s25 = smov %s2673_s26  ;;  %s3726_s26 = smov %s2907_s1 }
 0x7c0   : > { %s3727_s27 = smov %s2685_s29  ;;  %s3728_s28 = smov %s2689_s30 }
 0x7c1   : > { %s3729_s29 = smov %s3719_s8  ;;  %28 = sbr.rel (!%p26_p11) target bundleno = 20 (0x14), region = 153 }
 0x7c2   : > { %s3730_s30 = smov %s3720_s9 }
 0x7c6   :  { %2090 = vsyncpa [#allocation5], 1 }
 0x7c7   :  { %2092 = vsyncpa [#allocation5 + $0x1], 1 }
 0x7c8   :  { %2093 = vsyncpa [#allocation8], 1 }
 0x7c9   :  { %2095 = vsyncpa [#allocation8 + $0x1], 1 }
 0x7ca   :  { %2096 = vsyncpa [#allocation6], 1 }
 0x7cb   :  { %2098 = vsyncpa [#allocation6 + $0x1], 1 }

</bundles_post_ra>
